<compile_context>
chip_gen: v5e
topology: v5e:2x2
jax: 0.10.0
libtpu: 0.0.40
codegen_flags: <defaults>
</compile_context>

<pallas_src>
import functools

import jax
import jax.numpy as jnp
from jax.experimental import pallas as pl
from jax.experimental.pallas import tpu as pltpu

EPS = 1e-09

NUM_HIDDEN = 256
NUM_LATENT = 50
NUM_PIXELS_H = 32
NUM_PIXELS_W = 32
NUM_PIXELS = NUM_PIXELS_H * NUM_PIXELS_W


def _round_up(x, m):
    return ((x + m - 1) // m) * m


def _make_decoder_kernel(compute_mean):
    def kernel(z_ref, w1_ref, b1_ref, w2_ref, b2_ref, x_ref, *out_refs):
        if compute_mean:
            mean_ref, loss_ref = out_refs
        else:
            (loss_ref,) = out_refs

        # ---- MLP: relu(z @ W1 + b1) @ W2 + b2 (bf16 MXU operands, f32 acc) ----
        z = z_ref[...].astype(jnp.bfloat16)
        h = jnp.dot(z, w1_ref[...], preferred_element_type=jnp.float32)
        h = jnp.maximum(h + b1_ref[...], 0.0)
        logits = jnp.dot(h.astype(w2_ref.dtype), w2_ref[...],
                         preferred_element_type=jnp.float32)
        logits = logits + b2_ref[...]

        # e = exp(-|l|): single EUP exp per pixel; e <= 1 so (1 + e) is well
        # conditioned.  Shared by the sigmoid and the softplus below.
        e = jnp.exp(-jnp.abs(logits))

        if compute_mean:
            # sigmoid(l) derived from the same exp via the approx EUP reciprocal.
            inv = pl.reciprocal(1.0 + e, approx=True)          # 1/(1+exp(-|l|))
            x_hat = jnp.where(logits >= 0.0, inv, e * inv)     # == sigmoid(l)
            mean_ref[...] = x_hat.astype(mean_ref.dtype)

        # log sigmoid(l) = l - softplus(l);  log(1 - sigmoid(l)) = -softplus(l)
        #   => x*log(s) + (1-x)*log(1-s) = x*l - softplus(l)
        # softplus(l) = max(l, 0) + log(1 + exp(-|l|))  (stable, no EPS needed).
        x = x_ref[...].astype(jnp.float32)
        softplus = jnp.maximum(logits, 0.0) + jnp.log(1.0 + e)
        ll = x * logits - softplus
        loss_ref[...] = (-jnp.sum(ll, axis=-1, keepdims=True)).astype(loss_ref.dtype)

    return kernel


@functools.partial(jax.jit,
                   static_argnames=("block_b", "mean_dtype", "compute_mean"))
def decoder_forward(z, w1, b1, w2, b2, images, *, block_b=256,
                    mean_dtype=jnp.bfloat16, compute_mean=True):
    """Decoder forward pass.

    Args:
      z:      (B, num_latent) latent samples (any float dtype; cast to bf16 for MXU).
      w1:     (num_latent, num_hidden)   -- nn.Linear weight, pre-transposed.
      b1:     (num_hidden,)
      w2:     (num_hidden, num_pixels)   -- nn.Linear weight, pre-transposed.
      b2:     (num_pixels,)
      images: (B, num_pixels) Bernoulli targets.  Pass bf16 (or uint-binarized
              cast to bf16) from the producer: images is the dominant HBM stream.

    Returns:
      (images_mean [B, P] in mean_dtype, loss [B] f32) if compute_mean,
      else loss [B] f32 only.
    """
    B, L = z.shape
    H = w1.shape[1]
    P = w2.shape[1]

    # ---- batch tile: no host-side batch padding; grid is ragged ---------------
    bb = min(block_b, _round_up(B, 8))
    # For large batches keep >= 4 grid steps so each v7x TensorCore gets >= 2
    # pipelined steps (DMA/compute overlap); never drop below 128 rows.
    if B >= 512:
        bb = min(bb, max(128, _round_up(pl.cdiv(B, 4), 8)))
    grid = (pl.cdiv(B, bb),)

    # ---- host-side prep restricted to the tiny arrays --------------------------
    w1_b = w1.astype(jnp.bfloat16)
    w2_b = w2.astype(jnp.bfloat16)
    b1_2d = b1.reshape(1, H).astype(jnp.float32)
    b2_2d = b2.reshape(1, P).astype(jnp.float32)

    in_specs = [
        pl.BlockSpec((bb, L), lambda i: (i, 0)),   # z tile (full sub-128 K dim)
        pl.BlockSpec((L, H), lambda i: (0, 0)),    # W1 (bf16, grid-constant)
        pl.BlockSpec((1, H), lambda i: (0, 0)),    # b1 (f32)
        pl.BlockSpec((H, P), lambda i: (0, 0)),    # W2 (bf16, grid-constant)
        pl.BlockSpec((1, P), lambda i: (0, 0)),    # b2 (f32)
        pl.BlockSpec((bb, P), lambda i: (i, 0)),   # images tile (producer dtype)
    ]
    if compute_mean:
        out_shape = (jax.ShapeDtypeStruct((B, P), mean_dtype),
                     jax.ShapeDtypeStruct((B, 1), jnp.float32))
        out_specs = [pl.BlockSpec((bb, P), lambda i: (i, 0)),
                     pl.BlockSpec((bb, 1), lambda i: (i, 0))]
    else:
        out_shape = (jax.ShapeDtypeStruct((B, 1), jnp.float32),)
        out_specs = [pl.BlockSpec((bb, 1), lambda i: (i, 0))]

    # Advisory cost estimate so XLA schedules neighboring ops around the call.
    mean_bytes = B * P * jnp.dtype(mean_dtype).itemsize if compute_mean else 0
    cost = pl.CostEstimate(
        flops=2 * B * (L * H + H * P) + 8 * B * P,
        transcendentals=(3 if compute_mean else 2) * B * P,
        bytes_accessed=(B * L * z.dtype.itemsize
                        + L * H * 2 + H * 4 + H * P * 2 + P * 4
                        + B * P * images.dtype.itemsize
                        + mean_bytes + B * 4),
    )

    outs = pl.pallas_call(
        _make_decoder_kernel(compute_mean),
        out_shape=out_shape,
        grid_spec=pltpu.PrefetchScalarGridSpec(
            num_scalar_prefetch=0,
            grid=grid,
            in_specs=in_specs,
            out_specs=out_specs,
        ),
        compiler_params=pltpu.CompilerParams(
            dimension_semantics=("parallel",)),
        cost_estimate=cost,
    )(z, w1_b, b1_2d, w2_b, b2_2d, images)

    if compute_mean:
        mean, loss = outs
        return mean, loss[:, 0]
    (loss,) = outs
    return loss[:, 0]


def _reference(z, w1, b1, w2, b2, images):
    h = jnp.maximum(z @ w1 + b1, 0.0)
    x_hat = jax.nn.sigmoid(h @ w2 + b2)
    loss = -jnp.sum(jnp.log(x_hat + EPS) * images
                    + jnp.log(1.0 - x_hat + EPS) * (1.0 - images), axis=-1)
    return x_hat, loss


if __name__ == "__main__":
    B = 16
    key = jax.random.PRNGKey(0)
    k_z, k_w1, k_b1, k_w2, k_b2, k_x = jax.random.split(key, 6)

    # Deterministic synthetic parameters (shapes per nn.Linear in __init__),
    # stored pre-transposed as (in_features, out_features).
    z = jax.random.normal(k_z, (B, NUM_LATENT), dtype=jnp.float32)
    w1 = 0.05 * jax.random.normal(k_w1, (NUM_LATENT, NUM_HIDDEN), dtype=jnp.float32)
    b1 = 0.01 * jax.random.normal(k_b1, (NUM_HIDDEN,), dtype=jnp.float32)
    w2 = 0.05 * jax.random.normal(k_w2, (NUM_HIDDEN, NUM_PIXELS), dtype=jnp.float32)
    b2 = 0.01 * jax.random.normal(k_b2, (NUM_PIXELS,), dtype=jnp.float32)
    # Producer stores Bernoulli targets in bf16 (halves the dominant HBM stream).
    images = jax.random.uniform(k_x, (B, NUM_PIXELS), dtype=jnp.float32).astype(
        jnp.bfloat16)

    mean, loss = decoder_forward(z, w1, b1, w2, b2, images)
    loss_only = decoder_forward(z, w1, b1, w2, b2, images, compute_mean=False)
    jax.block_until_ready((mean, loss, loss_only))

    x_f32 = images.astype(jnp.float32)
    mean_ref, loss_ref = _reference(z, w1, b1, w2, b2, x_f32)

    # Tolerances account for bf16 MXU operands, bf16 mean output and the
    # approximate EUP reciprocal (accumulation is kept in f32 throughout).
    assert mean.shape == (B, NUM_PIXELS) and loss.shape == (B,)
    assert loss_only.shape == (B,)
    assert jnp.allclose(mean.astype(jnp.float32), mean_ref, atol=2e-2, rtol=0.0)
    assert jnp.allclose(loss, loss_ref, atol=1.0, rtol=1e-2)
    assert jnp.allclose(loss_only, loss, atol=1e-3, rtol=1e-5)

    print("KERNEL_OK")
</pallas_src>

<mosaic_0001>
module attributes {stable_mosaic.version = 11 : i64} {
  func.func @kernel(%arg0: i32, %arg1: memref<16x50xf32, #tpu.memory_space<vmem>>, %arg2: memref<50x256xbf16, #tpu.memory_space<vmem>>, %arg3: memref<1x256xf32, #tpu.memory_space<vmem>>, %arg4: memref<256x1024xbf16, #tpu.memory_space<vmem>>, %arg5: memref<1x1024xf32, #tpu.memory_space<vmem>>, %arg6: memref<16x1024xbf16, #tpu.memory_space<vmem>>, %arg7: memref<16x1024xbf16, #tpu.memory_space<vmem>>, %arg8: memref<16x1xf32, #tpu.memory_space<vmem>>) attributes {dimension_semantics = [#tpu.dimension_semantics<parallel>], iteration_bounds = array<i64: 1>, scalar_prefetch = 0 : i64, scratch_operands = 0 : i64, tpu.core_type = #tpu.core_type<tc>, window_params = [{transform_indices = @transform_0, window_bounds = array<i64: 16, 50>}, {pipeline_mode = #tpu.pipeline_mode<synchronous>, transform_indices = @transform_1, window_bounds = array<i64: 50, 256>}, {pipeline_mode = #tpu.pipeline_mode<synchronous>, transform_indices = @transform_2, window_bounds = array<i64: 1, 256>}, {pipeline_mode = #tpu.pipeline_mode<synchronous>, transform_indices = @transform_3, window_bounds = array<i64: 256, 1024>}, {pipeline_mode = #tpu.pipeline_mode<synchronous>, transform_indices = @transform_4, window_bounds = array<i64: 1, 1024>}, {transform_indices = @transform_5, window_bounds = array<i64: 16, 1024>}, {transform_indices = @transform_6, window_bounds = array<i64: 16, 1024>}, {transform_indices = @transform_7, window_bounds = array<i64: 16, 1>}]} {
    %c0 = arith.constant 0 : index
    %c0_0 = arith.constant 0 : index
    %0 = vector.load %arg1[%c0, %c0_0] : memref<16x50xf32, #tpu.memory_space<vmem>>, vector<16x50xf32>
    %1 = arith.truncf %0 : vector<16x50xf32> to vector<16x50xbf16>
    %c0_1 = arith.constant 0 : index
    %c0_2 = arith.constant 0 : index
    %2 = vector.load %arg2[%c0_1, %c0_2] : memref<50x256xbf16, #tpu.memory_space<vmem>>, vector<50x256xbf16>
    %cst = arith.constant dense<0.000000e+00> : vector<16x256xf32>
    %3 = tpu.matmul %1, %2, %cst {dimension_numbers = #tpu.dot_dimension_numbers<[1], [0], [0], [1], [0, 0, 1, 1], [], []>} : vector<16x50xbf16>, vector<50x256xbf16>, vector<16x256xf32> -> vector<16x256xf32>
    %c0_3 = arith.constant 0 : index
    %c0_4 = arith.constant 0 : index
    %4 = vector.load %arg3[%c0_3, %c0_4] : memref<1x256xf32, #tpu.memory_space<vmem>>, vector<1x256xf32>
    %5 = vector.broadcast %4 : vector<1x256xf32> to vector<16x256xf32>
    %6 = arith.addf %3, %5 : vector<16x256xf32>
    %cst_5 = arith.constant 0.000000e+00 : f32
    %7 = vector.broadcast %cst_5 : f32 to vector<16x256xf32>
    %8 = arith.maximumf %6, %7 : vector<16x256xf32>
    %9 = arith.truncf %8 : vector<16x256xf32> to vector<16x256xbf16>
    %c0_6 = arith.constant 0 : index
    %c0_7 = arith.constant 0 : index
    %10 = vector.load %arg4[%c0_6, %c0_7] : memref<256x1024xbf16, #tpu.memory_space<vmem>>, vector<256x1024xbf16>
    %cst_8 = arith.constant dense<0.000000e+00> : vector<16x1024xf32>
    %11 = tpu.matmul %9, %10, %cst_8 {dimension_numbers = #tpu.dot_dimension_numbers<[1], [0], [0], [1], [0, 0, 1, 1], [], []>} : vector<16x256xbf16>, vector<256x1024xbf16>, vector<16x1024xf32> -> vector<16x1024xf32>
    %c0_9 = arith.constant 0 : index
    %c0_10 = arith.constant 0 : index
    %12 = vector.load %arg5[%c0_9, %c0_10] : memref<1x1024xf32, #tpu.memory_space<vmem>>, vector<1x1024xf32>
    %13 = vector.broadcast %12 : vector<1x1024xf32> to vector<16x1024xf32>
    %14 = arith.addf %11, %13 : vector<16x1024xf32>
    %15 = math.absf %14 : vector<16x1024xf32>
    %cst_11 = arith.constant 0.000000e+00 : f32
    %16 = vector.broadcast %cst_11 : f32 to vector<16x1024xf32>
    %17 = arith.subf %16, %15 : vector<16x1024xf32>
    %18 = math.exp %17 : vector<16x1024xf32>
    %cst_12 = arith.constant 1.000000e+00 : f32
    %19 = vector.broadcast %cst_12 : f32 to vector<16x1024xf32>
    %20 = arith.addf %19, %18 : vector<16x1024xf32>
    %21 = tpu.reciprocal %20 {approx = true} : vector<16x1024xf32> -> vector<16x1024xf32>
    %cst_13 = arith.constant 0.000000e+00 : f32
    %22 = vector.broadcast %cst_13 : f32 to vector<16x1024xf32>
    %23 = arith.cmpf oge, %14, %22 : vector<16x1024xf32>
    %24 = arith.mulf %18, %21 : vector<16x1024xf32>
    %25 = arith.select %23, %21, %24 : vector<16x1024xi1>, vector<16x1024xf32>
    %26 = arith.truncf %25 : vector<16x1024xf32> to vector<16x1024xbf16>
    %c0_14 = arith.constant 0 : index
    %c0_15 = arith.constant 0 : index
    %27 = vector.load %arg7[%c0_14, %c0_15] : memref<16x1024xbf16, #tpu.memory_space<vmem>>, vector<16x1024xbf16>
    tpu.vector_store %arg7[%c0_14, %c0_15], %26 {strides = array<i32>} : memref<16x1024xbf16, #tpu.memory_space<vmem>>, vector<16x1024xbf16>,
    %c0_16 = arith.constant 0 : index
    %c0_17 = arith.constant 0 : index
    %28 = vector.load %arg6[%c0_16, %c0_17] : memref<16x1024xbf16, #tpu.memory_space<vmem>>, vector<16x1024xbf16>
    %29 = arith.extf %28 : vector<16x1024xbf16> to vector<16x1024xf32>
    %cst_18 = arith.constant 0.000000e+00 : f32
    %30 = vector.broadcast %cst_18 : f32 to vector<16x1024xf32>
    %31 = arith.maximumf %14, %30 : vector<16x1024xf32>
    %cst_19 = arith.constant 1.000000e+00 : f32
    %32 = vector.broadcast %cst_19 : f32 to vector<16x1024xf32>
    %33 = arith.addf %32, %18 : vector<16x1024xf32>
    %34 = math.log %33 : vector<16x1024xf32>
    %35 = arith.addf %31, %34 : vector<16x1024xf32>
    %36 = arith.mulf %29, %14 : vector<16x1024xf32>
    %37 = arith.subf %36, %35 : vector<16x1024xf32>
    %cst_20 = arith.constant dense<0.000000e+00> : vector<16xf32>
    %38 = vector.multi_reduction <add>, %37, %cst_20 [1] : vector<16x1024xf32> to vector<16xf32>
    %39 = vector.shape_cast %38 : vector<16xf32> to vector<16x1xf32>
    %cst_21 = arith.constant 0.000000e+00 : f32
    %40 = vector.broadcast %cst_21 : f32 to vector<16x1xf32>
    %41 = arith.subf %40, %39 : vector<16x1xf32>
    %c0_22 = arith.constant 0 : index
    %c0_23 = arith.constant 0 : index
    %42 = vector.load %arg8[%c0_22, %c0_23] : memref<16x1xf32, #tpu.memory_space<vmem>>, vector<16x1xf32>
    tpu.vector_store %arg8[%c0_22, %c0_23], %41 {strides = array<i32>} : memref<16x1xf32, #tpu.memory_space<vmem>>, vector<16x1xf32>,
    return
  }
  func.func @transform_0(%arg0: i32) -> (i32, i32) {
    %c0_i32 = arith.constant 0 : i32
    %c0_i32_0 = arith.constant 0 : i32
    return %arg0, %c0_i32 : i32, i32
  }
  func.func @transform_1(%arg0: i32) -> (i32, i32) {
    %c0_i32 = arith.constant 0 : i32
    %c0_i32_0 = arith.constant 0 : i32
    %c0_i32_1 = arith.constant 0 : i32
    return %c0_i32, %c0_i32_0 : i32, i32
  }
  func.func @transform_2(%arg0: i32) -> (i32, i32) {
    %c0_i32 = arith.constant 0 : i32
    %c0_i32_0 = arith.constant 0 : i32
    %c0_i32_1 = arith.constant 0 : i32
    return %c0_i32, %c0_i32_0 : i32, i32
  }
  func.func @transform_3(%arg0: i32) -> (i32, i32) {
    %c0_i32 = arith.constant 0 : i32
    %c0_i32_0 = arith.constant 0 : i32
    %c0_i32_1 = arith.constant 0 : i32
    return %c0_i32, %c0_i32_0 : i32, i32
  }
  func.func @transform_4(%arg0: i32) -> (i32, i32) {
    %c0_i32 = arith.constant 0 : i32
    %c0_i32_0 = arith.constant 0 : i32
    %c0_i32_1 = arith.constant 0 : i32
    return %c0_i32, %c0_i32_0 : i32, i32
  }
  func.func @transform_5(%arg0: i32) -> (i32, i32) {
    %c0_i32 = arith.constant 0 : i32
    %c0_i32_0 = arith.constant 0 : i32
    return %arg0, %c0_i32 : i32, i32
  }
  func.func @transform_6(%arg0: i32) -> (i32, i32) {
    %c0_i32 = arith.constant 0 : i32
    %c0_i32_0 = arith.constant 0 : i32
    return %arg0, %c0_i32 : i32, i32
  }
  func.func @transform_7(%arg0: i32) -> (i32, i32) {
    %c0_i32 = arith.constant 0 : i32
    %c0_i32_0 = arith.constant 0 : i32
    return %arg0, %c0_i32 : i32, i32
  }
}

</mosaic_0001>

<bundles_post_ra>
// kernel: decoder_forward.1
= control target key start
LH: loop header
LB: loop body
LE: loop exit
PB: predicated region body
PF: predicated region fallthrough
CT: control target
= control target key end

     0   :  { %vm82_vm0 = vcmask 1040384   ;;  %vm78_vm1 = vcmask 408576   ;;  %s3336_s0 = inlined_call_operand.vmem [shape: f32[16,50], index: 0, kind: input, shape index: {}]   ;;  %s3337_s1 = inlined_call_operand.vmem [shape: bf16[50,256], index: 1, kind: input, shape index: {}]   ;;  %s3338_s2 = inlined_call_operand.vmem [shape: f32[1,256], index: 2, kind: input, shape index: {}]   ;;  %s3339_s3 = inlined_call_operand.vmem [shape: bf16[256,1024], index: 3, kind: input, shape index: {}]   ;;  %s3340_s4 = inlined_call_operand.vmem [shape: f32[1,1024], index: 4, kind: input, shape index: {}]   ;;  %s3341_s5 = inlined_call_operand.vmem [shape: bf16[16,1024], index: 5, kind: input, shape index: {}]   ;;  %s3342_s6 = inlined_call_operand.hbm [shape: bf16[16,1024], index: 6, kind: output, shape index: {0}]   ;;  %s3343_s7 = inlined_call_operand.vmem [shape: f32[16,1], index: 7, kind: output, shape index: {1}]  }
   0x1   :  { %v36_v0 = vld [vmem:[%s3337_s1 + $0x30] sm:$0x11]  ;;  %v1476_v3 = vld [vmem:[%s3337_s1 + $0x20] sm:$0xf]  ;;  %v2001_v6 = vld [vmem:[%s3337_s1 + $0x24] sm:$0xf0] }
   0x2   :  { %v62_v1 = vunpack.c.l.b16 %v36_v0  ;;  %v63_v2 = vunpack.c.h.b16 %v36_v0  ;;  %v2000_v7 = vld [vmem:[%s3337_s1 + $0x24] sm:$0xf]  ;;  %v1478_v8 = vld [vmem:[%s3337_s1 + $0x28] sm:$0xf0]  ;;  %v1710_v11 = vld [vmem:[%s3339_s3 + $0x1c0] sm:$0xf]  ;;  %v1477_v13 = vor.u32 %v2001_v6, %v1476_v3 }
   0x3   :  { %v2062_v12 = vld [vmem:[%s3339_s3 + $0x1dc] sm:$0xf0]  ;;  %v1481_v14 = vor.u32 %v2000_v7, %v1478_v8  ;;  %v1468_v15 = vld [vmem:[%s3337_s1 + $0x10] sm:$0xf]  ;;  %v1999_v19 = vld [vmem:[%s3337_s1 + $0x14] sm:$0xf0] }
   0x4   :  { %v70_v4 = vpack.c.b16 %v62_v1, %v62_v1  ;;  %v71_v5 = vpack.c.b16 %v63_v2, %v63_v2  ;;  %v1711_v16 = vor.u32 %v2062_v12, %v1710_v11  ;;  %v1966_v17 = vld [vmem:[%s3339_s3 + $0x3c0] sm:$0xf]  ;;  %v1998_v20 = vld [vmem:[%s3337_s1 + $0x14] sm:$0xf]  ;;  %v1470_v21 = vld [vmem:[%s3337_s1 + $0x18] sm:$0xf0]  ;;  %v1469_v31 = vor.u32 %v1999_v19, %v1468_v15 }
   0x5   :  { %v2126_v18 = vld [vmem:[%s3339_s3 + $0x3dc] sm:$0xf0]  ;;  %v1997_v27 = vld [vmem:[%s3337_s1 + $0x4] sm:$0xf0]  ;;  %v1996_v28 = vld [vmem:[%s3337_s1 + $0x4] sm:$0xf]  ;;  %v1473_v32 = vor.u32 %v1998_v20, %v1470_v21 }
   0x6   :  { %v84_v9 = vsel %vm82_vm0, %v70_v4, 0  ;;  %v87_v10 = vsel %vm82_vm0, %v71_v5, 0  ;;  %v1967_v22 = vor.u32 %v2126_v18, %v1966_v17  ;;  %909 = vmatpush.bf16.msra.mxu2 %v1711_v16  ;;  %v1678_v23 = vld [vmem:[%s3339_s3 + $0x180] sm:$0xf]  ;;  %v1462_v33 = vld [vmem:[%s3337_s1 + $0x8] sm:$0xf0] }
   0x7   :  { %93 = vmatpush.bf16.msra.mxu0 %v84_v9  ;;  %107 = vmatpush.bf16.msra.mxu1 %v87_v10  ;;  %v2054_v24 = vld [vmem:[%s3339_s3 + $0x19c] sm:$0xf0]  ;;  %v2058_v34 = vld [vmem:[%s3339_s3 + $0x1c4] sm:$0xf]  ;;  %v1465_v48 = vor.u32 %v1996_v28, %v1462_v33  ;;  %v28_v50 = vld [vmem:[%s3336_s0 + $0x8] sm:$0xff] }
   0x8   :  { %v1934_v25 = vld [vmem:[%s3339_s3 + $0x380] sm:$0xf]  ;;  %923 = vmatpush.bf16.msra.mxu3 %v1967_v22  ;;  %v1679_v29 = vor.u32 %v2054_v24, %v1678_v23  ;;  %v1712_v40 = vld [vmem:[%s3339_s3 + $0x1e0] sm:$0xf0] }
   0x9   :  { %v1460_v26 = vld [vmem:[%s3337_s1] sm:$0xf]  ;;  %v2122_v41 = vld [vmem:[%s3339_s3 + $0x3c4] sm:$0xf]  ;;  %v1715_v51 = vor.u32 %v2058_v34, %v1712_v40 }
   0xa   :  { %v2118_v30 = vld [vmem:[%s3339_s3 + $0x39c] sm:$0xf0]  ;;  %v1968_v42 = vld [vmem:[%s3339_s3 + $0x3e0] sm:$0xf0]  ;;  %910 = vmatpush.bf16.msra.mxu2 %v1679_v29  ;;  %v1461_v47 = vor.u32 %v1997_v27, %v1460_v26 }
   0xb   :  { %94 = vmatpush.bf16.msra.mxu0 %v1477_v13  ;;  %108 = vmatpush.bf16.msra.mxu1 %v1481_v14  ;;  %v1935_v35 = vor.u32 %v2118_v30, %v1934_v25  ;;  %v1646_v36 = vld [vmem:[%s3339_s3 + $0x140] sm:$0xf]  ;;  %v1971_v52 = vor.u32 %v2122_v41, %v1968_v42  ;;  %v2050_v53 = vld [vmem:[%s3339_s3 + $0x184] sm:$0xf] }
   0xc   :  { %v2046_v37 = vld [vmem:[%s3339_s3 + $0x15c] sm:$0xf0]  ;;  %v1680_v56 = vld [vmem:[%s3339_s3 + $0x1a0] sm:$0xf0] }
   0xd   :  { %v1902_v38 = vld [vmem:[%s3339_s3 + $0x340] sm:$0xf]  ;;  %v1647_v43 = vor.u32 %v2046_v37, %v1646_v36  ;;  %924 = vmatpush.bf16.msra.mxu3 %v1935_v35  ;;  %v2114_v57 = vld [vmem:[%s3339_s3 + $0x384] sm:$0xf]  ;;  %v1683_v0 = vor.u32 %v2050_v53, %v1680_v56  ;;  %v1718_v36 = vld [vmem:[%s3339_s3 + $0x1c8] sm:$0xf] }
   0xe   :  { %v2110_v39 = vld [vmem:[%s3339_s3 + $0x35c] sm:$0xf0]  ;;  %v1936_v58 = vld [vmem:[%s3339_s3 + $0x3a0] sm:$0xf0]  ;;  %v2063_v37 = vld [vmem:[%s3339_s3 + $0x1e4] sm:$0xf0] }
   0xf   :  { %v1903_v44 = vor.u32 %v2110_v39, %v1902_v38  ;;  %v1614_v45 = vld [vmem:[%s3339_s3 + $0x100] sm:$0xf]  ;;  %95 = vmatpush.bf16.msra.mxu0 %v1469_v31  ;;  %109 = vmatpush.bf16.msra.mxu1 %v1473_v32  ;;  %v1939_v1 = vor.u32 %v2114_v57, %v1936_v58  ;;  %v2042_v2 = vld [vmem:[%s3339_s3 + $0x144] sm:$0xf] }
  0x10   :  { %v2038_v46 = vld [vmem:[%s3339_s3 + $0x11c] sm:$0xf0]  ;;  %911 = vmatpush.bf16.msra.mxu2 %v1647_v43  ;;  %v1648_v5 = vld [vmem:[%s3339_s3 + $0x160] sm:$0xf0] }
  0x11   :  { %v27_v49 = vld [vmem:[%s3336_s0] sm:$0xff]  ;;  %v1615_v59 = vor.u32 %v2038_v46, %v1614_v45  ;;  %925 = vmatpush.bf16.msra.mxu3 %v1903_v44  ;;  %v1651_v12 = vor.u32 %v2042_v2, %v1648_v5 }
  0x12   :  { %v1870_v54 = vld [vmem:[%s3339_s3 + $0x300] sm:$0xf]  ;;  %v29_v60 = vpack.c.bf16 %v28_v50, %v27_v49  ;;  %v2106_v6 = vld [vmem:[%s3339_s3 + $0x344] sm:$0xf]  ;;  %v2127_v49 = vld [vmem:[%s3339_s3 + $0x3e4] sm:$0xf0] }
  0x13   :  { %v2102_v55 = vld [vmem:[%s3339_s3 + $0x31c] sm:$0xf0]  ;;  %96 = vmatpush.bf16.msra.mxu0 %v1461_v47  ;;  %110 = vmatpush.bf16.msra.mxu1 %v1465_v48  ;;  %v1904_v7 = vld [vmem:[%s3339_s3 + $0x360] sm:$0xf0]  ;;  %v1719_v47 = vor.u32 %v2063_v37, %v1718_v36  ;;  %v1974_v48 = vld [vmem:[%s3339_s3 + $0x3c8] sm:$0xf] }
  0x14   :  { %v1582_v61 = vld [vmem:[%s3339_s3 + $0xc0] sm:$0xf]  ;;  %v1871_v63 = vor.u32 %v2102_v55, %v1870_v54  ;;  %912 = vmatpush.bf16.msra.mxu2 %v1615_v59  ;;  %v1907_v13 = vor.u32 %v2106_v6, %v1904_v7  ;;  %v2034_v14 = vld [vmem:[%s3339_s3 + $0x104] sm:$0xf]  ;;  %v1975_v59 = vor.u32 %v2127_v49, %v1974_v48 }
  0x15   :  { %v2030_v62 = vld [vmem:[%s3339_s3 + $0xdc] sm:$0xf0]  ;;  %v1616_v17 = vld [vmem:[%s3339_s3 + $0x120] sm:$0xf0] }
  0x16   :  { %v1838_v3 = vld [vmem:[%s3339_s3 + $0x2c0] sm:$0xf]  ;;  %v1583_v8 = vor.u32 %v2030_v62, %v1582_v61  ;;  %1482 = vmatmul.msk.bf16.vlgmr.msra.gmra.mxu0 %vm78_vm1, %v29_v60  ;;  %1483 = vmatmul.msk.bf16.vlgmr.msra.gmra.mxu1 %vm78_vm1, %v29_v60  ;;  %v2098_v18 = vld [vmem:[%s3339_s3 + $0x304] sm:$0xf]  ;;  %v1619_v24 = vor.u32 %v2034_v14, %v1616_v17  ;;  %v1942_v61 = vld [vmem:[%s3339_s3 + $0x388] sm:$0xf] }
  0x17   :  { %937 = vmatpush.bf16.msrb.mxu0 %v1715_v51  ;;  %951 = vmatpush.bf16.msrb.mxu1 %v1971_v52  ;;  %v2094_v4 = vld [vmem:[%s3339_s3 + $0x2dc] sm:$0xf0]  ;;  %v1872_v19 = vld [vmem:[%s3339_s3 + $0x320] sm:$0xf0]  ;;  %v1686_v51 = vld [vmem:[%s3339_s3 + $0x188] sm:$0xf] }
  0x18   :  { %v1550_v9 = vld [vmem:[%s3339_s3 + $0x80] sm:$0xf]  ;;  %926 = vmatpush.bf16.msra.mxu3 %v1871_v63  ;;  %v1839_v11 = vor.u32 %v2094_v4, %v1838_v3  ;;  %913 = vmatpush.bf16.msra.mxu2 %v1583_v8  ;;  %v1875_v25 = vor.u32 %v2098_v18, %v1872_v19  ;;  %v2026_v26 = vld [vmem:[%s3339_s3 + $0xc4] sm:$0xf]  ;;  %v2055_v52 = vld [vmem:[%s3339_s3 + $0x1a4] sm:$0xf0] }
  0x19   :  { %v2022_v10 = vld [vmem:[%s3339_s3 + $0x9c] sm:$0xf0]  ;;  %v1584_v29 = vld [vmem:[%s3339_s3 + $0xe0] sm:$0xf0]  ;;  %v1687_v60 = vor.u32 %v2055_v52, %v1686_v51  ;;  %v2119_v62 = vld [vmem:[%s3339_s3 + $0x3a4] sm:$0xf0] }
  0x1a   :  { %v1806_v15 = vld [vmem:[%s3339_s3 + $0x280] sm:$0xf]  ;;  %v1551_v20 = vor.u32 %v2022_v10, %v1550_v9  ;;  %v2090_v30 = vld [vmem:[%s3339_s3 + $0x2c4] sm:$0xf]  ;;  %v1587_v38 = vor.u32 %v2026_v26, %v1584_v29 }
  0x1b   :  { %938 = vmatpush.bf16.msrb.mxu0 %v1683_v0  ;;  %952 = vmatpush.bf16.msrb.mxu1 %v1939_v1  ;;  %v2086_v16 = vld [vmem:[%s3339_s3 + $0x29c] sm:$0xf0]  ;;  %v1840_v31 = vld [vmem:[%s3339_s3 + $0x2e0] sm:$0xf0] }
  0x1c   :  { %v1518_v21 = vld [vmem:[%s3339_s3 + $0x40] sm:$0xf]  ;;  %927 = vmatpush.bf16.msra.mxu3 %v1839_v11  ;;  %v1807_v23 = vor.u32 %v2086_v16, %v1806_v15  ;;  %914 = vmatpush.bf16.msra.mxu2 %v1551_v20  ;;  %v1843_v39 = vor.u32 %v2090_v30, %v1840_v31  ;;  %v2018_v40 = vld [vmem:[%s3339_s3 + $0x84] sm:$0xf] }
  0x1d   :  { %v2014_v22 = vld [vmem:[%s3339_s3 + $0x5c] sm:$0xf0]  ;;  %v1552_v43 = vld [vmem:[%s3339_s3 + $0xa0] sm:$0xf0] }
  0x1e   :  { %v1774_v27 = vld [vmem:[%s3339_s3 + $0x240] sm:$0xf]  ;;  %v1519_v32 = vor.u32 %v2014_v22, %v1518_v21  ;;  %v2082_v44 = vld [vmem:[%s3339_s3 + $0x284] sm:$0xf]  ;;  %v1555_v53 = vor.u32 %v2018_v40, %v1552_v43 }
  0x1f   :  { %939 = vmatpush.bf16.msrb.mxu0 %v1651_v12  ;;  %953 = vmatpush.bf16.msrb.mxu1 %v1907_v13  ;;  %v2078_v28 = vld [vmem:[%s3339_s3 + $0x25c] sm:$0xf0]  ;;  %v1808_v45 = vld [vmem:[%s3339_s3 + $0x2a0] sm:$0xf0] }
  0x20   :  { %v1486_v33 = vld [vmem:[%s3339_s3] sm:$0xf]  ;;  %928 = vmatpush.bf16.msra.mxu3 %v1807_v23  ;;  %v1775_v35 = vor.u32 %v2078_v28, %v1774_v27  ;;  %915 = vmatpush.bf16.msra.mxu2 %v1519_v32  ;;  %v1811_v54 = vor.u32 %v2082_v44, %v1808_v45  ;;  %v2010_v55 = vld [vmem:[%s3339_s3 + $0x44] sm:$0xf] }
  0x21   :  { %v2006_v34 = vld [vmem:[%s3339_s3 + $0x1c] sm:$0xf0]  ;;  %v1520_v56 = vld [vmem:[%s3339_s3 + $0x60] sm:$0xf0] }
  0x22   :  { %v1742_v41 = vld [vmem:[%s3339_s3 + $0x200] sm:$0xf]  ;;  %v1487_v46 = vor.u32 %v2006_v34, %v1486_v33  ;;  %v2074_v57 = vld [vmem:[%s3339_s3 + $0x244] sm:$0xf] }
  0x23   :  { %940 = vmatpush.bf16.msrb.mxu0 %v1619_v24  ;;  %954 = vmatpush.bf16.msrb.mxu1 %v1875_v25  ;;  %v2070_v42 = vld [vmem:[%s3339_s3 + $0x21c] sm:$0xf0]  ;;  %v1776_v58 = vld [vmem:[%s3339_s3 + $0x260] sm:$0xf0] }
  0x24   :  { %929 = vmatpush.bf16.msra.mxu3 %v1775_v35  ;;  %v1743_v50 = vor.u32 %v2070_v42, %v1742_v41  ;;  %916 = vmatpush.bf16.msra.mxu2 %v1487_v46 }
  0x27   :  { %941 = vmatpush.bf16.msrb.mxu0 %v1587_v38  ;;  %955 = vmatpush.bf16.msrb.mxu1 %v1843_v39 }
  0x28   :  { %965 = vmatpush.bf16.msrb.mxu2 %v1719_v47 }
  0x29   :  { %13 = vsyncpa [#allocation3], 0  ;;  %930 = vmatpush.bf16.msra.mxu3 %v1743_v50  ;;  %v1654_v63 = vld [vmem:[%s3339_s3 + $0x148] sm:$0xf]  ;;  %v1523_v1 = vor.u32 %v2010_v55, %v1520_v56  ;;  %v1779_v2 = vor.u32 %v2074_v57, %v1776_v58  ;;  %v2002_v3 = vld [vmem:[%s3339_s3 + $0x4] sm:$0xf]  ;;  %v1943_v9 = vor.u32 %v2119_v62, %v1942_v61 }
  0x2a   :  { %v2047_v0 = vld [vmem:[%s3339_s3 + $0x164] sm:$0xf0]  ;;  %v1488_v4 = vld [vmem:[%s3339_s3 + $0x20] sm:$0xf0]  ;;  %v2059_v7 = vld [vmem:[%s3339_s3 + $0x1cc] sm:$0xf] }
  0x2b   :  { %942 = vmatpush.bf16.msrb.mxu0 %v1555_v53  ;;  %956 = vmatpush.bf16.msrb.mxu1 %v1811_v54  ;;  %v2066_v5 = vld [vmem:[%s3339_s3 + $0x204] sm:$0xf]  ;;  %v1720_v8 = vld [vmem:[%s3339_s3 + $0x1e8] sm:$0xf0]  ;;  %v1655_v12 = vor.u32 %v2047_v0, %v1654_v63  ;;  %v1910_v13 = vld [vmem:[%s3339_s3 + $0x348] sm:$0xf]  ;;  %v1491_v17 = vor.u32 %v2002_v3, %v1488_v4 }
  0x2c   :  { %v1744_v6 = vld [vmem:[%s3339_s3 + $0x220] sm:$0xf0]  ;;  %v2123_v10 = vld [vmem:[%s3339_s3 + $0x3cc] sm:$0xf]  ;;  %966 = vmatpush.bf16.msrb.mxu2 %v1687_v60  ;;  %v2111_v14 = vld [vmem:[%s3339_s3 + $0x364] sm:$0xf0]  ;;  %v1723_v19 = vor.u32 %v2059_v7, %v1720_v8 }
  0x2d   :  { %979 = vmatpush.bf16.msrb.mxu3 %v1975_v59  ;;  %v1976_v11 = vld [vmem:[%s3339_s3 + $0x3e8] sm:$0xf0]  ;;  %v1622_v15 = vld [vmem:[%s3339_s3 + $0x108] sm:$0xf]  ;;  %v1747_v18 = vor.u32 %v2066_v5, %v1744_v6  ;;  %v1911_v25 = vor.u32 %v2111_v14, %v1910_v13  ;;  %s1442_s0 = sshll.u32 %s3342_s6, 4  ;;  %s2255_s29 = smov [#allocation2]   ;;  %s1443_s0 = int_to_ptr.hbm [resolvable:$true] %s1442_s0 }
  0x2e   :  { %v2039_v16 = vld [vmem:[%s3339_s3 + $0x124] sm:$0xf0]  ;;  %v1979_v20 = vor.u32 %v2123_v10, %v1976_v11  ;;  %v2051_v21 = vld [vmem:[%s3339_s3 + $0x18c] sm:$0xf]  ;;  %s1440_s1 = sshll.u32 %s2255_s29, 4  ;;  %s2256_s30 = smov 512   ;;  %s1441_s1 = int_to_ptr.vmem [resolvable:$true] %s1440_s1 }
  0x2f   :  { %943 = vmatpush.bf16.msrb.mxu0 %v1523_v1  ;;  %957 = vmatpush.bf16.msrb.mxu1 %v1779_v2  ;;  %v1688_v22 = vld [vmem:[%s3339_s3 + $0x1a8] sm:$0xf0]  ;;  %v1623_v26 = vor.u32 %v2039_v16, %v1622_v15  ;;  %v1878_v27 = vld [vmem:[%s3339_s3 + $0x308] sm:$0xf]  ;;  %s2257_s6 = smov 32  }
  0x30   :  { %v2115_v23 = vld [vmem:[%s3339_s3 + $0x38c] sm:$0xf]  ;;  %967 = vmatpush.bf16.msrb.mxu2 %v1655_v12  ;;  %v2103_v28 = vld [vmem:[%s3339_s3 + $0x324] sm:$0xf0]  ;;  %v1691_v29 = vor.u32 %v2051_v21, %v1688_v22 }
  0x31   :  { %980 = vmatpush.bf16.msrb.mxu3 %v1943_v9  ;;  %v1944_v24 = vld [vmem:[%s3339_s3 + $0x3a8] sm:$0xf0]  ;;  %v1879_v35 = vor.u32 %v2103_v28, %v1878_v27  ;;  %v1590_v44 = vld [vmem:[%s3339_s3 + $0xc8] sm:$0xf]  ;;  %v37_v28 = vld [vmem:[%s3338_s2] sm:$0x3] }
  0x32   :  { %v1947_v30 = vor.u32 %v2115_v23, %v1944_v24  ;;  %v2043_v31 = vld [vmem:[%s3339_s3 + $0x14c] sm:$0xf]  ;;  %v2031_v45 = vld [vmem:[%s3339_s3 + $0xe4] sm:$0xf0] }
  0x33   :  { %944 = vmatpush.bf16.msrb.mxu0 %v1491_v17  ;;  %958 = vmatpush.bf16.msrb.mxu1 %v1747_v18  ;;  %v1656_v32 = vld [vmem:[%s3339_s3 + $0x168] sm:$0xf0]  ;;  %v1846_v46 = vld [vmem:[%s3339_s3 + $0x2c8] sm:$0xf]  ;;  %v1591_v47 = vor.u32 %v2031_v45, %v1590_v44  ;;  %v1728_v44 = vld [vmem:[%s3339_s3 + $0x1f0] sm:$0xf0] }
  0x34   :  { %v2107_v33 = vld [vmem:[%s3339_s3 + $0x34c] sm:$0xf]  ;;  %968 = vmatpush.bf16.msrb.mxu2 %v1623_v26  ;;  %v1659_v36 = vor.u32 %v2043_v31, %v1656_v32  ;;  %v2095_v48 = vld [vmem:[%s3339_s3 + $0x2e4] sm:$0xf0]  ;;  %v39_v31 = vperm.slane %v37_v28, 0  ;;  %v40_v32 = vperm.slane %v37_v28, 1 }
  0x35   :  { %981 = vmatpush.bf16.msrb.mxu3 %v1911_v25  ;;  %v1912_v34 = vld [vmem:[%s3339_s3 + $0x368] sm:$0xf0]  ;;  %v1847_v51 = vor.u32 %v2095_v48, %v1846_v46  ;;  %v1558_v56 = vld [vmem:[%s3339_s3 + $0x88] sm:$0xf]  ;;  %v2124_v45 = vld [vmem:[%s3339_s3 + $0x3d4] sm:$0xf] }
  0x36   :  { %v1915_v37 = vor.u32 %v2107_v33, %v1912_v34  ;;  %v2035_v38 = vld [vmem:[%s3339_s3 + $0x10c] sm:$0xf]  ;;  %v2023_v57 = vld [vmem:[%s3339_s3 + $0xa4] sm:$0xf0]  ;;  %v2032_v28 = vld [vmem:[%s3339_s3 + $0xec] sm:$0xf0] }
  0x37   :  { %993 = vmatpush.bf16.msra.mxu0 %v1723_v19  ;;  %1007 = vmatpush.bf16.msra.mxu1 %v1979_v20  ;;  %v1624_v39 = vld [vmem:[%s3339_s3 + $0x128] sm:$0xf0]  ;;  %v1814_v58 = vld [vmem:[%s3339_s3 + $0x288] sm:$0xf]  ;;  %v1559_v59 = vor.u32 %v2023_v57, %v1558_v56  ;;  %v2056_v56 = vld [vmem:[%s3339_s3 + $0x1ac] sm:$0xf0] }
  0x38   :  { %v2099_v40 = vld [vmem:[%s3339_s3 + $0x30c] sm:$0xf]  ;;  %v1627_v42 = vor.u32 %v2035_v38, %v1624_v39  ;;  %969 = vmatpush.bf16.msrb.mxu2 %v1591_v47  ;;  %v2087_v60 = vld [vmem:[%s3339_s3 + $0x2a4] sm:$0xf0] }
  0x39   :  { %982 = vmatpush.bf16.msrb.mxu3 %v1879_v35  ;;  %v1880_v41 = vld [vmem:[%s3339_s3 + $0x328] sm:$0xf0]  ;;  %v1815_v63 = vor.u32 %v2087_v60, %v1814_v58  ;;  %v1526_v4 = vld [vmem:[%s3339_s3 + $0x48] sm:$0xf]  ;;  %v2120_v60 = vld [vmem:[%s3339_s3 + $0x3ac] sm:$0xf0] }
  0x3a   :  { %v1883_v43 = vor.u32 %v2099_v40, %v1880_v41  ;;  %v2027_v49 = vld [vmem:[%s3339_s3 + $0xcc] sm:$0xf]  ;;  %v2015_v5 = vld [vmem:[%s3339_s3 + $0x64] sm:$0xf0]  ;;  %v2064_v40 = vld [vmem:[%s3339_s3 + $0x1ec] sm:$0xf0] }
  0x3b   :  { %994 = vmatpush.bf16.msra.mxu0 %v1691_v29  ;;  %1008 = vmatpush.bf16.msra.mxu1 %v1947_v30  ;;  %v1592_v50 = vld [vmem:[%s3339_s3 + $0xe8] sm:$0xf0]  ;;  %v1782_v6 = vld [vmem:[%s3339_s3 + $0x248] sm:$0xf]  ;;  %v1527_v7 = vor.u32 %v2015_v5, %v1526_v4  ;;  %v1982_v41 = vld [vmem:[%s3339_s3 + $0x3d0] sm:$0xf] }
  0x3c   :  { %v1595_v52 = vor.u32 %v2027_v49, %v1592_v50  ;;  %v2091_v53 = vld [vmem:[%s3339_s3 + $0x2cc] sm:$0xf]  ;;  %970 = vmatpush.bf16.msrb.mxu2 %v1559_v59  ;;  %v2079_v8 = vld [vmem:[%s3339_s3 + $0x264] sm:$0xf0]  ;;  %v1984_v50 = vld [vmem:[%s3339_s3 + $0x3f0] sm:$0xf0] }
  0x3d   :  { %v1848_v54 = vld [vmem:[%s3339_s3 + $0x2e8] sm:$0xf0]  ;;  %983 = vmatpush.bf16.msrb.mxu3 %v1847_v51  ;;  %v1783_v11 = vor.u32 %v2079_v8, %v1782_v6  ;;  %v1494_v16 = vld [vmem:[%s3339_s3 + $0x8] sm:$0xf]  ;;  %v1987_v58 = vor.u32 %v2124_v45, %v1984_v50  ;;  %v1950_v59 = vld [vmem:[%s3339_s3 + $0x390] sm:$0xf] }
  0x3e   :  { %v1851_v55 = vor.u32 %v2091_v53, %v1848_v54  ;;  %v2019_v61 = vld [vmem:[%s3339_s3 + $0x8c] sm:$0xf]  ;;  %v2007_v17 = vld [vmem:[%s3339_s3 + $0x24] sm:$0xf0]  ;;  %v2048_v4 = vld [vmem:[%s3339_s3 + $0x16c] sm:$0xf0] }
  0x3f   :  { %995 = vmatpush.bf16.msra.mxu0 %v1659_v36  ;;  %1009 = vmatpush.bf16.msra.mxu1 %v1915_v37  ;;  %v1560_v62 = vld [vmem:[%s3339_s3 + $0xa8] sm:$0xf0]  ;;  %v1750_v18 = vld [vmem:[%s3339_s3 + $0x208] sm:$0xf]  ;;  %v1495_v19 = vor.u32 %v2007_v17, %v1494_v16  ;;  %v1726_v37 = vld [vmem:[%s3339_s3 + $0x1d0] sm:$0xf] }
  0x40   :  { %v1563_v0 = vor.u32 %v2019_v61, %v1560_v62  ;;  %v2083_v1 = vld [vmem:[%s3339_s3 + $0x28c] sm:$0xf]  ;;  %971 = vmatpush.bf16.msrb.mxu2 %v1527_v7  ;;  %v2071_v20 = vld [vmem:[%s3339_s3 + $0x224] sm:$0xf0]  ;;  %v1727_v53 = vor.u32 %v2064_v40, %v1726_v37  ;;  %v2052_v61 = vld [vmem:[%s3339_s3 + $0x194] sm:$0xf] }
  0x41   :  { %v1816_v2 = vld [vmem:[%s3339_s3 + $0x2a8] sm:$0xf0]  ;;  %984 = vmatpush.bf16.msrb.mxu3 %v1815_v63  ;;  %v1751_v23 = vor.u32 %v2071_v20, %v1750_v18  ;;  %v1696_v62 = vld [vmem:[%s3339_s3 + $0x1b0] sm:$0xf0]  ;;  %v1918_v7 = vld [vmem:[%s3339_s3 + $0x350] sm:$0xf] }
  0x42   :  { %v1819_v3 = vor.u32 %v2083_v1, %v1816_v2  ;;  %v2011_v9 = vld [vmem:[%s3339_s3 + $0x4c] sm:$0xf]  ;;  %v2116_v63 = vld [vmem:[%s3339_s3 + $0x394] sm:$0xf]  ;;  %v1951_v2 = vor.u32 %v2120_v60, %v1950_v59  ;;  %v1699_v5 = vor.u32 %v2052_v61, %v1696_v62  ;;  %v2112_v8 = vld [vmem:[%s3339_s3 + $0x36c] sm:$0xf0] }
  0x43   :  { %996 = vmatpush.bf16.msra.mxu0 %v1627_v42  ;;  %1010 = vmatpush.bf16.msra.mxu1 %v1883_v43  ;;  %v1528_v10 = vld [vmem:[%s3339_s3 + $0x68] sm:$0xf0]  ;;  %v2128_v42 = vld [vmem:[%s3339_s3 + $0x3ec] sm:$0xf0]  ;;  %v2060_v43 = vld [vmem:[%s3339_s3 + $0x1d4] sm:$0xf] }
  0x44   :  { %v1531_v12 = vor.u32 %v2011_v9, %v1528_v10  ;;  %v2075_v13 = vld [vmem:[%s3339_s3 + $0x24c] sm:$0xf]  ;;  %972 = vmatpush.bf16.msrb.mxu2 %v1495_v19  ;;  %v1983_v54 = vor.u32 %v2128_v42, %v1982_v41  ;;  %v1731_v57 = vor.u32 %v2060_v43, %v1728_v44  ;;  %v2044_v9 = vld [vmem:[%s3339_s3 + $0x154] sm:$0xf]  ;;  %v2040_v16 = vld [vmem:[%s3339_s3 + $0x12c] sm:$0xf0] }
  0x45   :  { %v1784_v14 = vld [vmem:[%s3339_s3 + $0x268] sm:$0xf0]  ;;  %985 = vmatpush.bf16.msrb.mxu3 %v1783_v11  ;;  %v1664_v10 = vld [vmem:[%s3339_s3 + $0x170] sm:$0xf0]  ;;  %v1886_v19 = vld [vmem:[%s3339_s3 + $0x310] sm:$0xf] }
  0x46   :  { %v1787_v15 = vor.u32 %v2075_v13, %v1784_v14  ;;  %v2003_v21 = vld [vmem:[%s3339_s3 + $0xc] sm:$0xf]  ;;  %v2108_v11 = vld [vmem:[%s3339_s3 + $0x354] sm:$0xf]  ;;  %v1919_v14 = vor.u32 %v2112_v8, %v1918_v7  ;;  %v1667_v17 = vor.u32 %v2044_v9, %v1664_v10  ;;  %v2104_v20 = vld [vmem:[%s3339_s3 + $0x32c] sm:$0xf0] }
  0x47   :  { %997 = vmatpush.bf16.msra.mxu0 %v1595_v52  ;;  %1011 = vmatpush.bf16.msra.mxu1 %v1851_v55  ;;  %v1496_v22 = vld [vmem:[%s3339_s3 + $0x28] sm:$0xf0]  ;;  %v1694_v55 = vld [vmem:[%s3339_s3 + $0x190] sm:$0xf]  ;;  %v2020_v45 = vld [vmem:[%s3339_s3 + $0x94] sm:$0xf] }
  0x48   :  { %v1499_v24 = vor.u32 %v2003_v21, %v1496_v22  ;;  %v2067_v25 = vld [vmem:[%s3339_s3 + $0x20c] sm:$0xf]  ;;  %v1695_v1 = vor.u32 %v2056_v56, %v1694_v55  ;;  %v2036_v21 = vld [vmem:[%s3339_s3 + $0x114] sm:$0xf]  ;;  %v2024_v40 = vld [vmem:[%s3339_s3 + $0xac] sm:$0xf0] }
  0x49   :  { %v1752_v26 = vld [vmem:[%s3339_s3 + $0x228] sm:$0xf0]  ;;  %986 = vmatpush.bf16.msrb.mxu3 %v1751_v23  ;;  %v1632_v22 = vld [vmem:[%s3339_s3 + $0x130] sm:$0xf0]  ;;  %v1822_v43 = vld [vmem:[%s3339_s3 + $0x290] sm:$0xf] }
  0x4a   :  { %v1755_v27 = vor.u32 %v2067_v25, %v1752_v26  ;;  %v2100_v23 = vld [vmem:[%s3339_s3 + $0x314] sm:$0xf]  ;;  %v1887_v26 = vor.u32 %v2104_v20, %v1886_v19  ;;  %v2088_v44 = vld [vmem:[%s3339_s3 + $0x2ac] sm:$0xf0]  ;;  %v2125_v19 = vld [vmem:[%s3339_s3 + $0x3dc] sm:$0xf] }
  0x4b   :  { %998 = vmatpush.bf16.msra.mxu0 %v1563_v0  ;;  %1012 = vmatpush.bf16.msra.mxu1 %v1819_v3  ;;  %v1952_v0 = vld [vmem:[%s3339_s3 + $0x3b0] sm:$0xf0]  ;;  %v1662_v3 = vld [vmem:[%s3339_s3 + $0x150] sm:$0xf]  ;;  %v1823_v50 = vor.u32 %v2088_v44, %v1822_v43  ;;  %v1992_v20 = vld [vmem:[%s3339_s3 + $0x3f8] sm:$0xf0] }
  0x4c   :  { %v1955_v6 = vor.u32 %v2116_v63, %v1952_v0  ;;  %v1663_v13 = vor.u32 %v2048_v4, %v1662_v3  ;;  %v2012_v59 = vld [vmem:[%s3339_s3 + $0x54] sm:$0xf]  ;;  %v1502_v63 = vld [vmem:[%s3339_s3 + $0x10] sm:$0xf]  ;;  %v2045_v43 = vld [vmem:[%s3339_s3 + $0x15c] sm:$0xf] }
  0x4d   :  { %v1536_v60 = vld [vmem:[%s3339_s3 + $0x70] sm:$0xf0]  ;;  %v1758_v3 = vld [vmem:[%s3339_s3 + $0x210] sm:$0xf]  ;;  %v1672_v44 = vld [vmem:[%s3339_s3 + $0x178] sm:$0xf0] }
  0x4e   :  { %v2076_v61 = vld [vmem:[%s3339_s3 + $0x254] sm:$0xf]  ;;  %v2072_v4 = vld [vmem:[%s3339_s3 + $0x22c] sm:$0xf0] }
  0x4f   :  { %999 = vmatpush.bf16.msra.mxu0 %v1531_v12  ;;  %1013 = vmatpush.bf16.msra.mxu1 %v1787_v15  ;;  %v1920_v12 = vld [vmem:[%s3339_s3 + $0x370] sm:$0xf0]  ;;  %v1630_v15 = vld [vmem:[%s3339_s3 + $0x110] sm:$0xf] }
  0x50   :  { %v1923_v18 = vor.u32 %v2108_v11, %v1920_v12  ;;  %v1631_v25 = vor.u32 %v2040_v16, %v1630_v15  ;;  %v1792_v62 = vld [vmem:[%s3339_s3 + $0x270] sm:$0xf0]  ;;  %v1734_v11 = vld [vmem:[%s3339_s3 + $0x1d8] sm:$0xf]  ;;  %v2061_v15 = vld [vmem:[%s3339_s3 + $0x1dc] sm:$0xf] }
  0x51   :  { %v2004_v7 = vld [vmem:[%s3339_s3 + $0x14] sm:$0xf]  ;;  %v2065_v12 = vld [vmem:[%s3339_s3 + $0x1f4] sm:$0xf0] }
  0x52   :  { %v1504_v8 = vld [vmem:[%s3339_s3 + $0x30] sm:$0xf0] }
  0x53   :  { %1000 = vmatpush.bf16.msra.mxu0 %v1499_v24  ;;  %1014 = vmatpush.bf16.msra.mxu1 %v1755_v27  ;;  %v1888_v24 = vld [vmem:[%s3339_s3 + $0x330] sm:$0xf0]  ;;  %v1598_v27 = vld [vmem:[%s3339_s3 + $0xd0] sm:$0xf] }
  0x54   :  { %v1599_v37 = vor.u32 %v2032_v28, %v1598_v27  ;;  %v2068_v9 = vld [vmem:[%s3339_s3 + $0x214] sm:$0xf]  ;;  %v1995_v28 = vor.u32 %v2125_v19, %v1992_v20  ;;  %v2085_v19 = vld [vmem:[%s3339_s3 + $0x29c] sm:$0xf] }
  0x55   :  { %v1760_v10 = vld [vmem:[%s3339_s3 + $0x230] sm:$0xf0]  ;;  %v1832_v20 = vld [vmem:[%s3339_s3 + $0x2b8] sm:$0xf0] }
  0x93   :  { %v98_v29 = vpop.f32.mrf.mxu0  ;;  %v112_v30 = vpop.f32.mrf.mxu1 }
  0x94   :  { %v99_v33 = vadd.f32 %v98_v29, %v39_v31  ;;  %v113_v34 = vadd.f32 %v112_v30, %v40_v32  ;;  %v1635_v29 = vor.u32 %v2036_v21, %v1632_v22  ;;  %v1891_v30 = vor.u32 %v2100_v23, %v1888_v24 }
  0x95   :  { %v1507_v21 = vor.u32 %v2004_v7, %v1504_v8  ;;  %v1763_v22 = vor.u32 %v2068_v9, %v1760_v10  ;;  %v1735_v23 = vor.u32 %v2065_v12, %v1734_v11  ;;  %v2093_v7 = vld [vmem:[%s3339_s3 + $0x2dc] sm:$0xf]  ;;  %v1574_v11 = vld [vmem:[%s3339_s3 + $0x98] sm:$0xf] }
  0x96   :  { %v117_v46 = vmax.f32 %v99_v33, 0.0  ;;  %v118_v47 = vmax.f32 %v113_v34, 0.0  ;;  %v2028_v33 = vld [vmem:[%s3339_s3 + $0xd4] sm:$0xf]  ;;  %v1864_v8 = vld [vmem:[%s3339_s3 + $0x2f8] sm:$0xf0] }
  0x97   :  { %v1600_v34 = vld [vmem:[%s3339_s3 + $0xf0] sm:$0xf0]  ;;  %v2025_v12 = vld [vmem:[%s3339_s3 + $0xb4] sm:$0xf0] }
  0x98   :  { %v1603_v41 = vor.u32 %v2028_v33, %v1600_v34  ;;  %v2117_v33 = vld [vmem:[%s3339_s3 + $0x39c] sm:$0xf] }
  0x99   :  { %v1960_v34 = vld [vmem:[%s3339_s3 + $0x3b8] sm:$0xf0] }
  0x9b   :  { %v100_v35 = vpop.f32.mrf.mxu0  ;;  %v114_v36 = vpop.f32.mrf.mxu1 }
  0x9c   :  { %v101_v38 = vadd.f32 %v100_v35, %v39_v31  ;;  %v115_v39 = vadd.f32 %v114_v36, %v40_v32  ;;  %v1854_v31 = vld [vmem:[%s3339_s3 + $0x2d0] sm:$0xf]  ;;  %v2092_v35 = vld [vmem:[%s3339_s3 + $0x2d4] sm:$0xf] }
  0x9d   :  { %v2096_v32 = vld [vmem:[%s3339_s3 + $0x2ec] sm:$0xf0]  ;;  %v1856_v36 = vld [vmem:[%s3339_s3 + $0x2f0] sm:$0xf0] }
  0x9e   :  { %v119_v48 = vmax.f32 %v101_v38, 0.0  ;;  %v120_v49 = vmax.f32 %v115_v39, 0.0  ;;  %v1855_v38 = vor.u32 %v2096_v32, %v1854_v31  ;;  %v1566_v39 = vld [vmem:[%s3339_s3 + $0x90] sm:$0xf]  ;;  %v1859_v42 = vor.u32 %v2092_v35, %v1856_v36  ;;  %v2053_v31 = vld [vmem:[%s3339_s3 + $0x19c] sm:$0xf] }
  0x9f   :  { %v1704_v32 = vld [vmem:[%s3339_s3 + $0x1b8] sm:$0xf0] }
  0xa0   :  { %v2754_v51 = vpack.c.bf16 %v119_v48, %v117_v46  ;;  %v2756_v52 = vpack.c.bf16 %v120_v49, %v118_v47  ;;  %v1568_v46 = vld [vmem:[%s3339_s3 + $0xb0] sm:$0xf0]  ;;  %v1567_v49 = vor.u32 %v2024_v40, %v1566_v39  ;;  %v1707_v39 = vor.u32 %v2053_v31, %v1704_v32  ;;  %v2077_v31 = vld [vmem:[%s3339_s3 + $0x25c] sm:$0xf] }
  0xa1   :  { %v2084_v47 = vld [vmem:[%s3339_s3 + $0x294] sm:$0xf]  ;;  %v1571_v55 = vor.u32 %v2020_v45, %v1568_v46  ;;  %v1963_v40 = vor.u32 %v2117_v33, %v1960_v34  ;;  %v2109_v45 = vld [vmem:[%s3339_s3 + $0x35c] sm:$0xf] }
  0xa2   :  { %917 = vmatmul.bf16.vlgmr.msra.gmra.mxu2 %v2754_v51  ;;  %931 = vmatmul.bf16.vlgmr.msra.gmra.mxu3 %v2756_v52  ;;  %v1824_v48 = vld [vmem:[%s3339_s3 + $0x2b0] sm:$0xf0]  ;;  %v1928_v46 = vld [vmem:[%s3339_s3 + $0x378] sm:$0xf0] }
  0xa3   :  { %945 = vmatmul.bf16.vlgmr.msrb.gmra.mxu0 %v2754_v51  ;;  %959 = vmatmul.bf16.vlgmr.msrb.gmra.mxu1 %v2756_v52  ;;  %v1827_v56 = vor.u32 %v2084_v47, %v1824_v48  ;;  %v1800_v32 = vld [vmem:[%s3339_s3 + $0x278] sm:$0xf0] }
  0xa4   :  { %1021 = vmatpush.bf16.msra.mxu2 %v1727_v53  ;;  %1035 = vmatpush.bf16.msra.mxu3 %v1983_v54  ;;  %v1534_v53 = vld [vmem:[%s3339_s3 + $0x50] sm:$0xf] }
  0xa5   :  { %1049 = vmatpush.bf16.msrb.mxu0 %v1731_v57  ;;  %1063 = vmatpush.bf16.msrb.mxu1 %v1987_v58  ;;  %v2016_v54 = vld [vmem:[%s3339_s3 + $0x6c] sm:$0xf0] }
  0xa6   :  { %v1790_v57 = vld [vmem:[%s3339_s3 + $0x250] sm:$0xf]  ;;  %v1535_v0 = vor.u32 %v2016_v54, %v1534_v53  ;;  %v1675_v53 = vor.u32 %v2045_v43, %v1672_v44  ;;  %v1931_v54 = vor.u32 %v2109_v45, %v1928_v46  ;;  %v2069_v43 = vld [vmem:[%s3339_s3 + $0x21c] sm:$0xf] }
  0xa7   :  { %v2080_v58 = vld [vmem:[%s3339_s3 + $0x26c] sm:$0xf0]  ;;  %v1768_v44 = vld [vmem:[%s3339_s3 + $0x238] sm:$0xf0] }
  0xa8   :  { %1022 = vmatpush.bf16.msra.mxu2 %v1695_v1  ;;  %1036 = vmatpush.bf16.msra.mxu3 %v1951_v2  ;;  %v1791_v1 = vor.u32 %v2080_v58, %v1790_v57  ;;  %v2008_v2 = vld [vmem:[%s3339_s3 + $0x2c] sm:$0xf0]  ;;  %v2037_v57 = vld [vmem:[%s3339_s3 + $0x11c] sm:$0xf] }
  0xa9   :  { %1050 = vmatpush.bf16.msrb.mxu0 %v1699_v5  ;;  %1064 = vmatpush.bf16.msrb.mxu1 %v1955_v6  ;;  %v1539_v5 = vor.u32 %v2012_v59, %v1536_v60  ;;  %v1795_v6 = vor.u32 %v2076_v61, %v1792_v62  ;;  %v1503_v16 = vor.u32 %v2008_v2, %v1502_v63  ;;  %v1640_v58 = vld [vmem:[%s3339_s3 + $0x138] sm:$0xf0]  ;;  %v1606_v63 = vld [vmem:[%s3339_s3 + $0xd8] sm:$0xf] }
  0xaa   :  { %v2101_v59 = vld [vmem:[%s3339_s3 + $0x31c] sm:$0xf] }
  0xab   :  { %v1896_v60 = vld [vmem:[%s3339_s3 + $0x338] sm:$0xf0] }
  0xac   :  { %1023 = vmatpush.bf16.msra.mxu2 %v1663_v13  ;;  %1037 = vmatpush.bf16.msra.mxu3 %v1919_v14  ;;  %v1990_v13 = vld [vmem:[%s3339_s3 + $0x3d8] sm:$0xf]  ;;  %v1899_v2 = vor.u32 %v2101_v59, %v1896_v60 }
  0xad   :  { %1051 = vmatpush.bf16.msrb.mxu0 %v1667_v17  ;;  %1065 = vmatpush.bf16.msrb.mxu1 %v1923_v18  ;;  %v2129_v14 = vld [vmem:[%s3339_s3 + $0x3f4] sm:$0xf0]  ;;  %v1759_v17 = vor.u32 %v2072_v4, %v1758_v3  ;;  %v1736_v18 = vld [vmem:[%s3339_s3 + $0x1f8] sm:$0xf0] }
  0xae   :  { %v1991_v24 = vor.u32 %v2129_v14, %v1990_v13  ;;  %v1739_v27 = vor.u32 %v2061_v15, %v1736_v18  ;;  %v1862_v3 = vld [vmem:[%s3339_s3 + $0x2d8] sm:$0xf]  ;;  %v1867_v14 = vor.u32 %v2093_v7, %v1864_v8  ;;  %v1576_v18 = vld [vmem:[%s3339_s3 + $0xb8] sm:$0xf0] }
  0xaf   :  { %v2097_v4 = vld [vmem:[%s3339_s3 + $0x2f4] sm:$0xf0] }
  0xb0   :  { %1024 = vmatpush.bf16.msra.mxu2 %v1631_v25  ;;  %1038 = vmatpush.bf16.msra.mxu3 %v1887_v26  ;;  %v1702_v25 = vld [vmem:[%s3339_s3 + $0x198] sm:$0xf]  ;;  %v1863_v10 = vor.u32 %v2097_v4, %v1862_v3 }
  0xb1   :  { %1052 = vmatpush.bf16.msrb.mxu0 %v1635_v29  ;;  %1066 = vmatpush.bf16.msrb.mxu1 %v1891_v30  ;;  %v2057_v26 = vld [vmem:[%s3339_s3 + $0x1b4] sm:$0xf0] }
  0xb2   :  { %973 = vmatmul.bf16.vlgmr.msrb.gmra.mxu2 %v2754_v51  ;;  %987 = vmatmul.bf16.vlgmr.msrb.gmra.mxu3 %v2756_v52  ;;  %v1958_v29 = vld [vmem:[%s3339_s3 + $0x398] sm:$0xf]  ;;  %v1703_v35 = vor.u32 %v2057_v26, %v1702_v25  ;;  %v1835_v26 = vor.u32 %v2085_v19, %v1832_v20 }
  0xb3   :  { %1001 = vmatmul.bf16.vlgmr.msra.gmra.mxu0 %v2754_v51  ;;  %1015 = vmatmul.bf16.vlgmr.msra.gmra.mxu1 %v2756_v52  ;;  %v2121_v30 = vld [vmem:[%s3339_s3 + $0x3b4] sm:$0xf0] }
  0xb4   :  { %1025 = vmatpush.bf16.msra.mxu2 %v1599_v37  ;;  %1039 = vmatpush.bf16.msra.mxu3 %v1855_v38  ;;  %v1959_v36 = vor.u32 %v2121_v30, %v1958_v29  ;;  %v1670_v37 = vld [vmem:[%s3339_s3 + $0x158] sm:$0xf]  ;;  %v2013_v29 = vld [vmem:[%s3339_s3 + $0x5c] sm:$0xf] }
  0xb5   :  { %1053 = vmatpush.bf16.msrb.mxu0 %v1603_v41  ;;  %1067 = vmatpush.bf16.msrb.mxu1 %v1859_v42  ;;  %v2049_v38 = vld [vmem:[%s3339_s3 + $0x174] sm:$0xf0]  ;;  %v1544_v30 = vld [vmem:[%s3339_s3 + $0x78] sm:$0xf0] }
  0xb6   :  { %v1926_v41 = vld [vmem:[%s3339_s3 + $0x358] sm:$0xf]  ;;  %v1671_v47 = vor.u32 %v2049_v38, %v1670_v37  ;;  %v1547_v37 = vor.u32 %v2013_v29, %v1544_v30  ;;  %v1803_v38 = vor.u32 %v2077_v31, %v1800_v32  ;;  %v3164_v32 = vld [vmem:[%s3341_s5 + $0x20] sm:$0xff] }
  0xb7   :  { %v2113_v42 = vld [vmem:[%s3339_s3 + $0x374] sm:$0xf0] }
  0xb8   :  { %1026 = vmatpush.bf16.msra.mxu2 %v1567_v49  ;;  %1040 = vmatpush.bf16.msra.mxu3 %v1823_v50  ;;  %v1927_v48 = vor.u32 %v2113_v42, %v1926_v41  ;;  %v1638_v49 = vld [vmem:[%s3339_s3 + $0x118] sm:$0xf]  ;;  %v2005_v41 = vld [vmem:[%s3339_s3 + $0x1c] sm:$0xf] }
  0xb9   :  { %1054 = vmatpush.bf16.msrb.mxu0 %v1571_v55  ;;  %1068 = vmatpush.bf16.msrb.mxu1 %v1827_v56  ;;  %v2041_v50 = vld [vmem:[%s3339_s3 + $0x134] sm:$0xf0]  ;;  %v1512_v42 = vld [vmem:[%s3339_s3 + $0x38] sm:$0xf0] }
  0xba   :  { %v1894_v55 = vld [vmem:[%s3339_s3 + $0x318] sm:$0xf]  ;;  %v1639_v61 = vor.u32 %v2041_v50, %v1638_v49  ;;  %v3137_v49 = vld [vmem:[%s3340_s4] sm:$0xff] }
  0xbb   :  { %v2105_v56 = vld [vmem:[%s3339_s3 + $0x334] sm:$0xf0]  ;;  %v254_v50 = vperm.slane %v3137_v49, 1  ;;  %v256_v8 = vperm.slane %v3137_v49, 3  ;;  %v255_v20 = vperm.slane %v3137_v49, 2 }
  0xbc   :  { %1027 = vmatpush.bf16.msra.mxu2 %v1535_v0  ;;  %1041 = vmatpush.bf16.msra.mxu3 %v1791_v1  ;;  %v1895_v62 = vor.u32 %v2105_v56, %v1894_v55  ;;  %v2033_v0 = vld [vmem:[%s3339_s3 + $0xf4] sm:$0xf0]  ;;  %v1643_v1 = vor.u32 %v2037_v57, %v1640_v58  ;;  %v253_v56 = vperm.slane %v3137_v49, 0 }
  0xbd   :  { %1055 = vmatpush.bf16.msrb.mxu0 %v1539_v5  ;;  %1069 = vmatpush.bf16.msrb.mxu1 %v1795_v6  ;;  %v2029_v5 = vld [vmem:[%s3339_s3 + $0xdc] sm:$0xf]  ;;  %v1607_v9 = vor.u32 %v2033_v0, %v1606_v63  ;;  %v1830_v15 = vld [vmem:[%s3339_s3 + $0x298] sm:$0xf] }
  0xbe   :  { %v1608_v6 = vld [vmem:[%s3339_s3 + $0xf8] sm:$0xf0] }
  0xbf   :  { %v1611_v13 = vor.u32 %v2029_v5, %v1608_v6 }
  0xc0   :  { %1028 = vmatpush.bf16.msra.mxu2 %v1503_v16  ;;  %1042 = vmatpush.bf16.msra.mxu3 %v1759_v17  ;;  %v2089_v16 = vld [vmem:[%s3339_s3 + $0x2b4] sm:$0xf0]  ;;  %v2021_v17 = vld [vmem:[%s3339_s3 + $0x9c] sm:$0xf] }
  0xc1   :  { %1056 = vmatpush.bf16.msrb.mxu0 %v1507_v21  ;;  %1070 = vmatpush.bf16.msrb.mxu1 %v1763_v22  ;;  %v1575_v21 = vor.u32 %v2025_v12, %v1574_v11  ;;  %v1831_v22 = vor.u32 %v2089_v16, %v1830_v15  ;;  %v1579_v25 = vor.u32 %v2021_v17, %v1576_v18 }
  0xc3   :  { %1029 = vmatmul.bf16.vlgmr.msra.gmra.mxu2 %v2754_v51  ;;  %1043 = vmatmul.bf16.vlgmr.msra.gmra.mxu3 %v2756_v52 }
  0xc4   :  { %1077 = vmatpush.bf16.msrb.mxu2 %v1735_v23  ;;  %1091 = vmatpush.bf16.msrb.mxu3 %v1991_v24  ;;  %v1542_v23 = vld [vmem:[%s3339_s3 + $0x58] sm:$0xf] }
  0xc5   :  { %1105 = vmatpush.bf16.msra.mxu0 %v1739_v27  ;;  %1119 = vmatpush.bf16.msra.mxu1 %v1995_v28  ;;  %v2017_v24 = vld [vmem:[%s3339_s3 + $0x74] sm:$0xf0] }
  0xc6   :  { %1057 = vmatmul.bf16.vlgmr.msrb.gmra.mxu0 %v2754_v51  ;;  %1071 = vmatmul.bf16.vlgmr.msrb.gmra.mxu1 %v2756_v52  ;;  %v1798_v27 = vld [vmem:[%s3339_s3 + $0x258] sm:$0xf]  ;;  %v1543_v33 = vor.u32 %v2017_v24, %v1542_v23 }
  0xc7   :  { %v2081_v28 = vld [vmem:[%s3339_s3 + $0x274] sm:$0xf0] }
  0xc8   :  { %1078 = vmatpush.bf16.msrb.mxu2 %v1703_v35  ;;  %1092 = vmatpush.bf16.msrb.mxu3 %v1959_v36  ;;  %v1799_v34 = vor.u32 %v2081_v28, %v1798_v27  ;;  %v1510_v35 = vld [vmem:[%s3339_s3 + $0x18] sm:$0xf]  ;;  %v1293_v27 = vld [vmem:[%s3341_s5] sm:$0xff] }
  0xc9   :  { %1106 = vmatpush.bf16.msra.mxu0 %v1707_v39  ;;  %1120 = vmatpush.bf16.msra.mxu1 %v1963_v40  ;;  %v2009_v36 = vld [vmem:[%s3339_s3 + $0x34] sm:$0xf0] }
  0xca   :  { %v1766_v39 = vld [vmem:[%s3339_s3 + $0x218] sm:$0xf]  ;;  %v1511_v45 = vor.u32 %v2009_v36, %v1510_v35 }
  0xcb   :  { %v2073_v40 = vld [vmem:[%s3339_s3 + $0x234] sm:$0xf0] }
  0xcc   :  { %1079 = vmatpush.bf16.msrb.mxu2 %v1671_v47  ;;  %1093 = vmatpush.bf16.msrb.mxu3 %v1927_v48  ;;  %v1767_v46 = vor.u32 %v2073_v40, %v1766_v39  ;;  %v1515_v47 = vor.u32 %v2005_v41, %v1512_v42  ;;  %v1771_v48 = vor.u32 %v2069_v43, %v1768_v44  ;;  %v1301_v41 = vunpack.c.l.bf16 %v1293_v27 }
  0xcd   :  { %1107 = vmatpush.bf16.msra.mxu0 %v1675_v53  ;;  %1121 = vmatpush.bf16.msra.mxu1 %v1931_v54  ;;  %v1310_v44 = vunpack.c.h.bf16 %v3164_v32 }
  0xd0   :  { %1080 = vmatpush.bf16.msrb.mxu2 %v1639_v61  ;;  %1094 = vmatpush.bf16.msrb.mxu3 %v1895_v62 }
  0xd1   :  { %1108 = vmatpush.bf16.msra.mxu0 %v1643_v1  ;;  %1122 = vmatpush.bf16.msra.mxu1 %v1899_v2 }
  0xd4   :  { %1081 = vmatpush.bf16.msrb.mxu2 %v1607_v9  ;;  %1095 = vmatpush.bf16.msrb.mxu3 %v1863_v10 }
  0xd5   :  { %1109 = vmatpush.bf16.msra.mxu0 %v1611_v13  ;;  %1123 = vmatpush.bf16.msra.mxu1 %v1867_v14 }
  0xd8   :  { %1082 = vmatpush.bf16.msrb.mxu2 %v1575_v21  ;;  %1096 = vmatpush.bf16.msrb.mxu3 %v1831_v22 }
  0xd9   :  { %1110 = vmatpush.bf16.msra.mxu0 %v1579_v25  ;;  %1124 = vmatpush.bf16.msra.mxu1 %v1835_v26 }
  0xdc   :  { %1083 = vmatpush.bf16.msrb.mxu2 %v1543_v33  ;;  %1097 = vmatpush.bf16.msrb.mxu3 %v1799_v34  ;;  %v3169_v33 = vld [vmem:[%s3341_s5 + $0x8] sm:$0xff] }
  0xdd   :  { %1111 = vmatpush.bf16.msra.mxu0 %v1547_v37  ;;  %1125 = vmatpush.bf16.msra.mxu1 %v1803_v38  ;;  %v1302_v37 = vunpack.c.h.bf16 %v1293_v27 }
  0xe0   :  { %1084 = vmatpush.bf16.msrb.mxu2 %v1511_v45  ;;  %1098 = vmatpush.bf16.msrb.mxu3 %v1767_v46  ;;  %v1309_v45 = vunpack.c.l.bf16 %v3164_v32  ;;  %v1304_v46 = vunpack.c.h.bf16 %v3169_v33 }
  0xe1   :  { %1112 = vmatpush.bf16.msra.mxu0 %v1515_v47  ;;  %1126 = vmatpush.bf16.msra.mxu1 %v1771_v48 }
  0xe3   :  { %1085 = vmatmul.bf16.vlgmr.msrb.gmra.mxu2 %v2754_v51  ;;  %1099 = vmatmul.bf16.vlgmr.msrb.gmra.mxu3 %v2756_v52 }
  0xe4   :  { %1113 = vmatmul.bf16.vlgmr.msra.gmra.mxu0 %v2754_v51  ;;  %1127 = vmatmul.bf16.vlgmr.msra.gmra.mxu1 %v2756_v52 }
 0x120   :  { %v946_v53 = vpop.f32.mrf.mxu0  ;;  %v960_v54 = vpop.f32.mrf.mxu1 }
 0x121   :  { %v947_v55 = vadd.f32 %v946_v53, %v254_v50 }
 0x123   :  { %v3141_v57 = vadd.f32 %v960_v54, %v947_v55  ;;  %v258_v54 = vperm.slane %v3137_v49, 5 }
 0x125   :  { %v1134_v58 = vand.u32 2147483647, %v3141_v57  ;;  %v918_v59 = vpop.f32.mrf.mxu2  ;;  %v932_v51 = vpop.f32.mrf.mxu3  ;;  %vm1230_vm2 = vcmp.ge.f32.partialorder %v3141_v57, 0.0 }
 0x126   :  { %v919_v60 = vadd.f32 %v918_v59, %v253_v56 }
 0x127   :  { %v1150_v52 = vsub.f32 0.0, %v1134_v58 }
 0x128   :  { %v3144_v61 = vadd.f32 %v932_v51, %v919_v60  ;;  %v948_v62 = vpop.f32.mrf.mxu0  ;;  %v962_v63 = vpop.f32.mrf.mxu1  ;;  %v1382_v51 = vmul.f32 %v1302_v37, %v3141_v57 }
 0x129   :  { %v1167_v0 = vmul.f32 1.442695, %v1150_v52  ;;  %v949_v1 = vadd.f32 %v948_v62, %v254_v50 }
 0x12a   :  { %v1133_v2 = vand.u32 2147483647, %v3144_v61  ;;  %vm1229_vm3 = vcmp.ge.f32.partialorder %v3144_v61, 0.0 }
 0x12b   :  { %2133 = vpow2.f32 %v1167_v0  ;;  %v3147_v3 = vadd.f32 %v962_v63, %v949_v1  ;;  %v1317_v0 = vmax.f32 %v3144_v61, 0.0 }
 0x12c   :  { %v1149_v4 = vsub.f32 0.0, %v1133_v2 }
 0x12d   :  { %v1142_v5 = vand.u32 2147483647, %v3147_v3  ;;  %v920_v6 = vpop.f32.mrf.mxu2  ;;  %v934_v7 = vpop.f32.mrf.mxu3  ;;  %vm1238_vm4 = vcmp.ge.f32.partialorder %v3147_v3, 0.0 }
 0x12e   :  { %v1165_v9 = vmul.f32 1.442695, %v1149_v4  ;;  %v921_v10 = vadd.f32 %v920_v6, %v253_v56  ;;  %v1318_v56 = vmax.f32 %v3141_v57, 0.0 }
 0x12f   :  { %v1158_v11 = vsub.f32 0.0, %v1142_v5 }
 0x130   :  { %2135 = vpow2.f32 %v1165_v9  ;;  %v3151_v12 = vadd.f32 %v934_v7, %v921_v10  ;;  %v1002_v13 = vpop.f32.mrf.mxu0  ;;  %v1016_v17 = vpop.f32.mrf.mxu1  ;;  %v1381_v7 = vmul.f32 %v1301_v41, %v3144_v61 }
 0x131   :  { %v2134_v14 = vpop.eup %2133  ;;  %v1183_v15 = vmul.f32 1.442695, %v1158_v11  ;;  %v1003_v16 = vadd.f32 %v1002_v13, %v256_v8 }
 0x132   :  { %v1198_v18 = vadd.f32 1.0, %v2134_v14  ;;  %v1141_v19 = vand.u32 2147483647, %v3151_v12  ;;  %vm1237_vm5 = vcmp.ge.f32.partialorder %v3151_v12, 0.0 }
 0x133   :  { %2137 = vpow2.f32 %v1183_v15  ;;  %v3155_v21 = vadd.f32 %v1016_v17, %v1003_v16 }
 0x134   :  { %2139 = vrcp.f32 %v1198_v18  ;;  %v1157_v22 = vsub.f32 0.0, %v1141_v19 }
 0x135   :  { %v1136_v23 = vand.u32 2147483647, %v3155_v21  ;;  %v974_v24 = vpop.f32.mrf.mxu2  ;;  %v988_v25 = vpop.f32.mrf.mxu3  ;;  %2141 = vlog2.f32 %v1198_v18  ;;  %vm1232_vm6 = vcmp.ge.f32.partialorder %v3155_v21, 0.0 }
 0x136   :  { %v2136_v26 = vpop.eup %2135  ;;  %v1181_v28 = vmul.f32 1.442695, %v1157_v22  ;;  %v975_v29 = vadd.f32 %v974_v24, %v255_v20 }
 0x137   :  { %v1197_v30 = vadd.f32 1.0, %v2136_v26  ;;  %v1152_v31 = vsub.f32 0.0, %v1136_v23 }
 0x138   :  { %2143 = vpow2.f32 %v1181_v28  ;;  %v3171_v34 = vadd.f32 %v988_v25, %v975_v29  ;;  %v1004_v35 = vpop.f32.mrf.mxu0  ;;  %v1018_v47 = vpop.f32.mrf.mxu1  ;;  %v257_v25 = vperm.slane %v3137_v49, 4 }
 0x139   :  { %v3173_v36 = vpop.eup %2137  ;;  %2145 = vrcp.f32 %v1197_v30  ;;  %v1171_v38 = vmul.f32 1.442695, %v1152_v31  ;;  %v1005_v39 = vadd.f32 %v1004_v35, %v256_v8  ;;  %v1390_v31 = vmul.f32 %v1310_v44, %v3147_v3 }
 0x13a   :  { %v2140_v40 = vpop.eup %2139  ;;  %2147 = vlog2.f32 %v1197_v30  ;;  %v1206_v42 = vadd.f32 1.0, %v3173_v36  ;;  %v1135_v43 = vand.u32 2147483647, %v3171_v34  ;;  %v1325_v44 = vmax.f32 %v3151_v12, 0.0 }
 0x13b   :  { %2149 = vpow2.f32 %v1171_v38  ;;  %v2142_v48 = vpop.eup %2141  ;;  %v3180_v53 = vadd.f32 %v1018_v47, %v1005_v39  ;;  %v1246_v55 = vmul.f32 %v2140_v40, %v2134_v14  ;;  %vm1231_vm7 = vcmp.ge.f32.partialorder %v3171_v34, 0.0 }
 0x13c   :  { %2151 = vrcp.f32 %v1206_v42  ;;  %v1151_v50 = vsub.f32 0.0, %v1135_v43  ;;  %v1336_v63 = vmul.f32 0.6931472, %v2142_v48 }
 0x13d   :  { %2153 = vlog2.f32 %v1206_v42  ;;  %v976_v58 = vpop.f32.mrf.mxu2  ;;  %v1144_v52 = vand.u32 2147483647, %v3180_v53  ;;  %v990_v4 = vpop.f32.mrf.mxu3  ;;  %v1262_v10 = vsel %vm1230_vm2, %v2140_v40, %v1246_v55  ;;  %vm1240_vm8 = vcmp.ge.f32.partialorder %v3180_v53, 0.0 }
 0x13e   :  { %v2144_v59 = vpop.eup %2143  ;;  %v1169_v60 = vmul.f32 1.442695, %v1151_v50  ;;  %v977_v2 = vadd.f32 %v976_v58, %v255_v20  ;;  %v1366_v20 = vadd.f32 %v1336_v63, %v1318_v56  ;;  %vm1433_vm2 = vcmask 7168  }
 0x13f   :  { %v2146_v62 = vpop.eup %2145  ;;  %v1205_v1 = vadd.f32 1.0, %v2144_v59  ;;  %v1160_v8 = vsub.f32 0.0, %v1144_v52 }
 0x140   :  { %v2148_v5 = vpop.eup %2147  ;;  %v1245_v6 = vmul.f32 %v2146_v62, %v2136_v26  ;;  %2155 = vpow2.f32 %v1169_v60  ;;  %v3194_v13 = vadd.f32 %v990_v4, %v977_v2  ;;  %v1326_v26 = vmax.f32 %v3147_v3, 0.0 }
 0x141   :  { %v3190_v9 = vpop.eup %2149  ;;  %v1334_v11 = vmul.f32 0.6931472, %v2148_v5  ;;  %2157 = vrcp.f32 %v1205_v1  ;;  %v1187_v17 = vmul.f32 1.442695, %v1160_v8  ;;  %v1398_v38 = vsub.f32 %v1382_v51, %v1366_v20 }
 0x142   :  { %v2152_v14 = vpop.eup %2151  ;;  %v1261_v15 = vsel %vm1229_vm3, %v2146_v62, %v1245_v6  ;;  %2159 = vlog2.f32 %v1205_v1  ;;  %v1200_v16 = vadd.f32 1.0, %v3190_v9  ;;  %v1143_v57 = vand.u32 2147483647, %v3194_v13 }
 0x143   :  { %v1058_v18 = vpop.f32.mrf.mxu0  ;;  %v2154_v19 = vpop.eup %2153  ;;  %v1277_v22 = vpack.c.bf16 %v1262_v10, %v1261_v15  ;;  %v1365_v23 = vadd.f32 %v1334_v11, %v1317_v0  ;;  %v1254_v30 = vmul.f32 %v2152_v14, %v3173_v36  ;;  %v1389_v1 = vmul.f32 %v1309_v45, %v3151_v12 }
 0x144   :  { %v1352_v24 = vmul.f32 0.6931472, %v2154_v19  ;;  %2161 = vrcp.f32 %v1200_v16  ;;  %v1159_v27 = vsub.f32 0.0, %v1143_v57  ;;  %v1072_v28 = vpop.f32.mrf.mxu1  ;;  %v1059_v35 = vadd.f32 %v1058_v18, %v258_v54 }
 0x145   :  { %1285 = vst [vmem:[#allocation2] sm:$0xff] %v1277_v22  ;;  %v1397_v61 = vsub.f32 %v1381_v7, %v1365_v23  ;;  %2163 = vlog2.f32 %v1200_v16  ;;  %v1270_v51 = vsel %vm1238_vm4, %v2152_v14, %v1254_v30  ;;  %v1303_v3 = vunpack.c.l.bf16 %v3169_v33 }
 0x146   :  { %v2156_v29 = vpop.eup %2155  ;;  %2165 = vpow2.f32 %v1187_v17  ;;  %v1185_v40 = vmul.f32 1.442695, %v1159_v27  ;;  %v1030_v41 = vpop.f32.mrf.mxu2  ;;  %v1374_v43 = vadd.f32 %v1352_v24, %v1326_v26  ;;  %v3208_v48 = vadd.f32 %v1072_v28, %v1059_v35 }
 0x147   :  { %v2158_v37 = vpop.eup %2157  ;;  %v1199_v39 = vadd.f32 1.0, %v2156_v29  ;;  %v1031_v36 = vadd.f32 %v1030_v41, %v257_v25  ;;  %v1044_v55 = vpop.f32.mrf.mxu3  ;;  %v3213_v56 = vadd.f32 %v1398_v38, %v1397_v61  ;;  %v1319_v16 = vmax.f32 %v3171_v34, 0.0 }
 0x148   :  { %v2160_v42 = vpop.eup %2159  ;;  %v1253_v47 = vmul.f32 %v2158_v37, %v2144_v59  ;;  %v1138_v59 = vand.u32 2147483647, %v3208_v48  ;;  %v1406_v4 = vsub.f32 %v1390_v31, %v1374_v43  ;;  %v1383_v35 = vmul.f32 %v1303_v3, %v3171_v34  ;;  %v1298_v43 = vld [vmem:[%s3341_s5 + $0x28] sm:$0xff] }
 0x149   :  { %v1350_v50 = vmul.f32 0.6931472, %v2160_v42  ;;  %2167 = vrcp.f32 %v1199_v39  ;;  %v3224_v6 = vadd.f32 %v1044_v55, %v1031_v36  ;;  %vm1239_vm9 = vcmp.ge.f32.partialorder %v3194_v13, 0.0 }
 0x14a   :  { %v2162_v58 = vpop.eup %2161  ;;  %v1269_v60 = vsel %vm1237_vm5, %v2158_v37, %v1253_v47  ;;  %2169 = vlog2.f32 %v1199_v39  ;;  %v1154_v5 = vsub.f32 0.0, %v1138_v59  ;;  %vm1234_vm10 = vcmp.ge.f32.partialorder %v3208_v48, 0.0 }
 0x14b   :  { %v1060_v52 = vpop.f32.mrf.mxu0  ;;  %v2164_v62 = vpop.eup %2163  ;;  %v1281_v63 = vpack.c.bf16 %v1270_v51, %v1269_v60  ;;  %v1373_v0 = vadd.f32 %v1350_v50, %v1325_v44  ;;  %2171 = vpow2.f32 %v1185_v40  ;;  %v1248_v8 = vmul.f32 %v2162_v58, %v3190_v9 }
 0x14c   :  { %v2166_v2 = vpop.eup %2165  ;;  %v1061_v11 = vadd.f32 %v1060_v52, %v258_v54  ;;  %v1175_v12 = vmul.f32 1.442695, %v1154_v5  ;;  %v1137_v32 = vand.u32 2147483647, %v3224_v6  ;;  %v1340_v15 = vmul.f32 0.6931472, %v2164_v62  ;;  %v1074_v17 = vpop.f32.mrf.mxu1 }
 0x14d   :  { %1289 = vst [vmem:[#allocation2 + $0x20] sm:$0xff] %v1281_v63  ;;  %v1405_v7 = vsub.f32 %v1389_v1, %v1373_v0  ;;  %v1208_v10 = vadd.f32 1.0, %v2166_v2  ;;  %v1264_v23 = vsel %vm1232_vm6, %v2162_v58, %v1248_v8  ;;  %v1384_v44 = vmul.f32 %v1304_v46, %v3155_v21 }
 0x14e   :  { %v1032_v9 = vpop.f32.mrf.mxu2  ;;  %v1153_v54 = vsub.f32 0.0, %v1137_v32  ;;  %v3235_v20 = vadd.f32 %v1074_v17, %v1061_v11  ;;  %v1312_v51 = vunpack.c.h.bf16 %v1298_v43  ;;  %v1311_v62 = vunpack.c.l.bf16 %v1298_v43 }
 0x14f   :  { %v2168_v45 = vpop.eup %2167  ;;  %v3232_v14 = vadd.f32 %v1406_v4, %v1405_v7  ;;  %2173 = vrcp.f32 %v1208_v10  ;;  %v1033_v24 = vadd.f32 %v1032_v9, %v257_v25  ;;  %v1046_v37 = vpop.f32.mrf.mxu3  ;;  %v1328_v5 = vmax.f32 %v3180_v53, 0.0 }
 0x150   :  { %v2170_v18 = vpop.eup %2169  ;;  %v1247_v19 = vmul.f32 %v2168_v45, %v2156_v29  ;;  %2175 = vlog2.f32 %v1208_v10  ;;  %v1173_v27 = vmul.f32 1.442695, %v1153_v54  ;;  %v1146_v28 = vand.u32 2147483647, %v3235_v20 }
 0x151   :  { %v2172_v22 = vpop.eup %2171  ;;  %v1338_v57 = vmul.f32 0.6931472, %v2170_v18  ;;  %2177 = vpow2.f32 %v1175_v12  ;;  %v1320_v29 = vmax.f32 %v3155_v21, 0.0  ;;  %v3246_v39 = vadd.f32 %v1046_v37, %v1033_v24 }
 0x152   :  { %v1263_v61 = vsel %vm1231_vm7, %v2168_v45, %v1247_v19  ;;  %v1207_v26 = vadd.f32 1.0, %v2172_v22  ;;  %v1162_v38 = vsub.f32 0.0, %v1146_v28  ;;  %v1391_v32 = vmul.f32 %v1311_v62, %v3194_v13 }
 0x153   :  { %v1278_v30 = vpack.c.bf16 %v1264_v23, %v1263_v61  ;;  %v1367_v31 = vadd.f32 %v1338_v57, %v1319_v16  ;;  %v1368_v25 = vadd.f32 %v1340_v15, %v1320_v29  ;;  %v1145_v36 = vand.u32 2147483647, %v3246_v39 }
 0x154   :  { %2179 = vrcp.f32 %v1207_v26  ;;  %v1191_v47 = vmul.f32 1.442695, %v1162_v38  ;;  %v1392_v54 = vmul.f32 %v1312_v51, %v3180_v53  ;;  %vm1233_vm11 = vcmp.ge.f32.partialorder %v3224_v6, 0.0 }
 0x155   :  { %v2174_v40 = vpop.eup %2173  ;;  %1286 = vst [vmem:[#allocation2 + $0x8] sm:$0xff] %v1278_v30  ;;  %v1399_v41 = vsub.f32 %v1383_v35, %v1367_v31  ;;  %2181 = vlog2.f32 %v1207_v26  ;;  %v1161_v55 = vsub.f32 0.0, %v1145_v36  ;;  %v1400_v60 = vsub.f32 %v1384_v44, %v1368_v25 }
 0x156   :  { %v2176_v42 = vpop.eup %2175  ;;  %2183 = vpow2.f32 %v1173_v27  ;;  %v1256_v58 = vmul.f32 %v2174_v40, %v2166_v2  ;;  %v1327_v2 = vmax.f32 %v3194_v13, 0.0  ;;  %vm1242_vm12 = vcmp.ge.f32.partialorder %v3235_v20, 0.0 }
 0x157   :  { %v2178_v34 = vpop.eup %2177  ;;  %2185 = vpow2.f32 %v1191_v47  ;;  %v1414_v59 = vadd.f32 %v3213_v56, %v1399_v41  ;;  %v1189_v63 = vmul.f32 1.442695, %v1161_v55  ;;  %v1356_v1 = vmul.f32 0.6931472, %v2176_v42 }
 0x158   :  { %v3255_v50 = vadd.f32 1.0, %v2178_v34  ;;  %v260_v56 = vperm.slane %v3137_v49, 7  ;;  %v1272_v3 = vsel %vm1240_vm8, %v2174_v40, %v1256_v58  ;;  %vm1241_vm13 = vcmp.ge.f32.partialorder %v3246_v39, 0.0 }
 0x159   :  { %v3261_v21 = vadd.f32 %v1414_v59, %v1400_v60  ;;  %v1376_v45 = vadd.f32 %v1356_v1, %v1328_v5 }
 0x15a   :  { %v2180_v52 = vpop.eup %2179  ;;  %2187 = vrcp.f32 %v3255_v50 }
 0x15b   :  { %v2182_v0 = vpop.eup %2181  ;;  %v1255_v33 = vmul.f32 %v2180_v52, %v2172_v22  ;;  %2189 = vpow2.f32 %v1189_v63  ;;  %v259_v22 = vperm.slane %v3137_v49, 6  ;;  %v1408_v24 = vsub.f32 %v1392_v54, %v1376_v45  ;;  %v1296_v54 = vld [vmem:[%s3341_s5 + $0x18] sm:$0xff] }
 0x15c   :  { %v2184_v46 = vpop.eup %2183  ;;  %v1354_v4 = vmul.f32 0.6931472, %v2182_v0 }
 0x15d   :  { %v1271_v7 = vsel %vm1239_vm9, %v2180_v52, %v1255_v33  ;;  %v1201_v8 = vadd.f32 1.0, %v2184_v46  ;;  %v2186_v10 = vpop.eup %2185 }
 0x15e   :  { %v1282_v11 = vpack.c.bf16 %v1272_v3, %v1271_v7  ;;  %v1375_v12 = vadd.f32 %v1354_v4, %v1327_v2  ;;  %v3267_v15 = vadd.f32 1.0, %v2186_v10 }
 0x15f   :  { %2191 = vrcp.f32 %v1201_v8 }
 0x160   :  { %1290 = vst [vmem:[#allocation2 + $0x28] sm:$0xff] %v1282_v11  ;;  %v1407_v9 = vsub.f32 %v1391_v32, %v1375_v12  ;;  %v2188_v19 = vpop.eup %2187  ;;  %2193 = vrcp.f32 %v3267_v15 }
 0x161   :  { %v1114_v16 = vpop.f32.mrf.mxu0  ;;  %v1128_v17 = vpop.f32.mrf.mxu1  ;;  %v1250_v26 = vmul.f32 %v2188_v19, %v2178_v34 }
 0x162   :  { %v1115_v18 = vadd.f32 %v1114_v16, %v260_v56  ;;  %v2190_v23 = vpop.eup %2189  ;;  %v1423_v13 = vadd.f32 %v3232_v14, %v1407_v9  ;;  %v1321_v16 = vmax.f32 %v3224_v6, 0.0 }
 0x163   :  { %v1209_v61 = vadd.f32 1.0, %v2190_v23  ;;  %v1266_v40 = vsel %vm1234_vm10, %v2188_v19, %v1250_v26  ;;  %v1299_v19 = vld [vmem:[%s3341_s5 + $0x30] sm:$0xff] }
 0x164   :  { %v3272_v57 = vadd.f32 %v1128_v17, %v1115_v18  ;;  %v3276_v53 = vadd.f32 %v1423_v13, %v1408_v24  ;;  %v1322_v24 = vmax.f32 %v3208_v48, 0.0 }
 0x165   :  { %v2192_v30 = vpop.eup %2191  ;;  %2195 = vrcp.f32 %v1209_v61 }
 0x166   :  { %v1140_v27 = vand.u32 2147483647, %v3272_v57  ;;  %v1086_v28 = vpop.f32.mrf.mxu2  ;;  %v1100_v29 = vpop.f32.mrf.mxu3  ;;  %v1249_v35 = vmul.f32 %v2192_v30, %v2184_v46  ;;  %vm1236_vm14 = vcmp.ge.f32.partialorder %v3272_v57, 0.0 }
 0x167   :  { %v1087_v31 = vadd.f32 %v1086_v28, %v259_v22  ;;  %v2194_v49 = vpop.eup %2193 }
 0x168   :  { %v1156_v37 = vsub.f32 0.0, %v1140_v27  ;;  %v1265_v25 = vsel %vm1233_vm11, %v2192_v30, %v1249_v35  ;;  %v1258_v34 = vmul.f32 %v2194_v49, %v2186_v10  ;;  %v1307_v30 = vunpack.c.l.bf16 %v1296_v54 }
 0x169   :  { %v3280_v14 = vadd.f32 %v1100_v29, %v1087_v31  ;;  %v1116_v38 = vpop.f32.mrf.mxu0  ;;  %v1279_v43 = vpack.c.bf16 %v1266_v40, %v1265_v25  ;;  %v1130_v36 = vpop.f32.mrf.mxu1  ;;  %v1314_v29 = vunpack.c.h.bf16 %v1299_v19  ;;  %v1308_v31 = vunpack.c.h.bf16 %v1296_v54 }
 0x16a   :  { %v1179_v41 = vmul.f32 1.442695, %v1156_v37  ;;  %v1117_v42 = vadd.f32 %v1116_v38, %v260_v56  ;;  %v1274_v63 = vsel %vm1242_vm12, %v2194_v49, %v1258_v34 }
 0x16b   :  { %v1139_v47 = vand.u32 2147483647, %v3280_v14  ;;  %v2196_v55 = vpop.eup %2195  ;;  %1287 = vst [vmem:[#allocation2 + $0x10] sm:$0xff] %v1279_v43  ;;  %vm1235_vm15 = vcmp.ge.f32.partialorder %v3280_v14, 0.0 }
 0x16c   :  { %2197 = vpow2.f32 %v1179_v41  ;;  %v3283_v44 = vadd.f32 %v1130_v36, %v1117_v42  ;;  %v1257_v51 = vmul.f32 %v2196_v55, %v2190_v23  ;;  %v1329_v41 = vmax.f32 %v3246_v39, 0.0 }
 0x16d   :  { %v1155_v58 = vsub.f32 0.0, %v1139_v47  ;;  %2199 = vlog2.f32 %v1201_v8  ;;  %v1324_v36 = vmax.f32 %v3272_v57, 0.0 }
 0x16e   :  { %v1148_v60 = vand.u32 2147483647, %v3283_v44  ;;  %v1088_v59 = vpop.f32.mrf.mxu2  ;;  %v1273_v0 = vsel %vm1241_vm13, %v2196_v55, %v1257_v51  ;;  %v1102_v33 = vpop.f32.mrf.mxu3  ;;  %2201 = vlog2.f32 %v3255_v50  ;;  %v1295_v50 = vld [vmem:[%s3341_s5 + $0x10] sm:$0xff]  ;;  %vm1244_vm0 = vcmp.ge.f32.partialorder %v3283_v44, 0.0 }
 0x16f   :  { %v1177_v52 = vmul.f32 1.442695, %v1155_v58  ;;  %v1089_v62 = vadd.f32 %v1088_v59, %v259_v22  ;;  %v1283_v46 = vpack.c.bf16 %v1274_v63, %v1273_v0  ;;  %v1305_v45 = vunpack.c.l.bf16 %v1295_v50 }
 0x170   :  { %v1164_v1 = vsub.f32 0.0, %v1148_v60  ;;  %v1306_v22 = vunpack.c.h.bf16 %v1295_v50 }
 0x171   :  { %2203 = vpow2.f32 %v1177_v52  ;;  %v3289_v2 = vadd.f32 %v1102_v33, %v1089_v62  ;;  %1291 = vst [vmem:[#allocation2 + $0x30] sm:$0xff] %v1283_v46  ;;  %v1385_v27 = vmul.f32 %v1305_v45, %v3224_v6 }
 0x172   :  { %v2198_v4 = vpop.eup %2197  ;;  %v1195_v56 = vmul.f32 1.442695, %v1164_v1  ;;  %v1386_v38 = vmul.f32 %v1306_v22, %v3208_v48  ;;  %v1323_v48 = vmax.f32 %v3280_v14, 0.0 }
 0x173   :  { %v2200_v3 = vpop.eup %2199  ;;  %v1147_v5 = vand.u32 2147483647, %v3289_v2  ;;  %v1204_v7 = vadd.f32 1.0, %v2198_v4  ;;  %vm1243_vm1 = vcmp.ge.f32.partialorder %v3289_v2, 0.0  ;;  %v1331_v22 = vmax.f32 %v3289_v2, 0.0 }
 0x174   :  { %2205 = vpow2.f32 %v1195_v56  ;;  %v2202_v10 = vpop.eup %2201  ;;  %v1342_v11 = vmul.f32 0.6931472, %v2200_v3  ;;  %v1300_v56 = vld [vmem:[%s3341_s5 + $0x38] sm:$0xff] }
 0x175   :  { %2207 = vlog2.f32 %v1209_v61  ;;  %v1163_v8 = vsub.f32 0.0, %v1147_v5  ;;  %v1344_v9 = vmul.f32 0.6931472, %v2202_v10  ;;  %v1313_v61 = vunpack.c.l.bf16 %v1299_v19 }
 0x176   :  { %2209 = vrcp.f32 %v1204_v7  ;;  %v1369_v23 = vadd.f32 %v1342_v11, %v1321_v16  ;;  %v1330_v5 = vmax.f32 %v3235_v20, 0.0  ;;  %v1394_v11 = vmul.f32 %v1314_v29, %v3235_v20 }
 0x177   :  { %v2204_v12 = vpop.eup %2203  ;;  %v1193_v32 = vmul.f32 1.442695, %v1163_v8  ;;  %2211 = vlog2.f32 %v1204_v7  ;;  %v1370_v35 = vadd.f32 %v1344_v9, %v1322_v24  ;;  %v1393_v42 = vmul.f32 %v1313_v61, %v3246_v39 }
 0x178   :  { %v1203_v17 = vadd.f32 1.0, %v2204_v12  ;;  %2213 = vlog2.f32 %v3267_v15  ;;  %v1401_v40 = vsub.f32 %v1385_v27, %v1369_v23  ;;  %v1316_v50 = vunpack.c.h.bf16 %v1300_v56 }
 0x179   :  { %2215 = vpow2.f32 %v1193_v32  ;;  %v1402_v51 = vsub.f32 %v1386_v38, %v1370_v35 }
 0x17a   :  { %v2206_v18 = vpop.eup %2205  ;;  %2217 = vrcp.f32 %v1203_v17  ;;  %v1416_v39 = vadd.f32 %v3261_v21, %v1401_v40  ;;  %v1388_v21 = vmul.f32 %v1308_v31, %v3272_v57  ;;  %v1332_v57 = vmax.f32 %v3283_v44, 0.0 }
 0x17b   :  { %v2208_v13 = vpop.eup %2207  ;;  %v1212_v26 = vadd.f32 1.0, %v2206_v18  ;;  %2219 = vlog2.f32 %v1203_v17  ;;  %v1315_v17 = vunpack.c.l.bf16 %v1300_v56 }
 0x17c   :  { %v2210_v15 = vpop.eup %2209  ;;  %v1358_v49 = vmul.f32 0.6931472, %v2208_v13  ;;  %v1417_v8 = vadd.f32 %v1416_v39, %v1402_v51 }
 0x17d   :  { %v2212_v28 = vpop.eup %2211  ;;  %2221 = vrcp.f32 %v1212_v26  ;;  %v1252_v43 = vmul.f32 %v2210_v15, %v2198_v4  ;;  %v1387_v4 = vmul.f32 %v1307_v30, %v3280_v14 }
 0x17e   :  { %v2214_v37 = vpop.eup %2213  ;;  %2223 = vlog2.f32 %v1212_v26  ;;  %v1348_v34 = vmul.f32 0.6931472, %v2212_v28  ;;  %v1377_v60 = vadd.f32 %v1358_v49, %v1329_v41  ;;  %v1395_v28 = vmul.f32 %v1315_v17, %v3289_v2 }
 0x17f   :  { %v2216_v25 = vpop.eup %2215  ;;  %v1268_v62 = vsel %vm1236_vm14, %v2210_v15, %v1252_v43  ;;  %v1360_v63 = vmul.f32 0.6931472, %v2214_v37 }
 0x180   :  { %v2218_v47 = vpop.eup %2217  ;;  %v1211_v6 = vadd.f32 1.0, %v2216_v25  ;;  %v1372_v46 = vadd.f32 %v1348_v34, %v1324_v36  ;;  %v1409_v10 = vsub.f32 %v1393_v42, %v1377_v60 }
 0x181   :  { %v2220_v55 = vpop.eup %2219  ;;  %v1251_v58 = vmul.f32 %v2218_v47, %v2204_v12  ;;  %v1378_v32 = vadd.f32 %v1360_v63, %v1330_v5 }
 0x182   :  { %2225 = vrcp.f32 %v1211_v6  ;;  %v1346_v59 = vmul.f32 0.6931472, %v2220_v55  ;;  %v1404_v14 = vsub.f32 %v1388_v21, %v1372_v46 }
 0x183   :  { %v1267_v52 = vsel %vm1235_vm15, %v2218_v47, %v1251_v58  ;;  %2227 = vlog2.f32 %v1211_v6  ;;  %v2222_v0 = vpop.eup %2221  ;;  %v1410_v61 = vsub.f32 %v1394_v11, %v1378_v32 }
 0x184   :  { %v1280_v1 = vpack.c.bf16 %v1268_v62, %v1267_v52  ;;  %v1371_v33 = vadd.f32 %v1346_v59, %v1323_v48  ;;  %v2224_v3 = vpop.eup %2223  ;;  %v1260_v12 = vmul.f32 %v2222_v0, %v2206_v18  ;;  %v1425_v18 = vadd.f32 %v3276_v53, %v1409_v10 }
 0x185   :  { %v1364_v9 = vmul.f32 0.6931472, %v2224_v3  ;;  %v1396_v53 = vmul.f32 %v1316_v50, %v3283_v44 }
 0x186   :  { %1288 = vst [vmem:[#allocation2 + $0x18] sm:$0xff] %v1280_v1  ;;  %v1403_v7 = vsub.f32 %v1387_v4, %v1371_v33  ;;  %v1276_v13 = vsel %vm1244_vm0, %v2222_v0, %v1260_v12  ;;  %v1426_v30 = vadd.f32 %v1425_v18, %v1410_v61 }
 0x187   :  { %v1380_v27 = vadd.f32 %v1364_v9, %v1332_v57 }
 0x188   :  { %v2226_v45 = vpop.eup %2225  ;;  %v1418_v16 = vadd.f32 %v1417_v8, %v1403_v7 }
 0x189   :  { %v2228_v19 = vpop.eup %2227  ;;  %v1259_v54 = vmul.f32 %v2226_v45, %v2216_v25  ;;  %v1412_v31 = vsub.f32 %v1396_v53, %v1380_v27 }
 0x18a   :  { %v1419_v23 = vadd.f32 %v1418_v16, %v1404_v14  ;;  %v1362_v20 = vmul.f32 0.6931472, %v2228_v19 }
 0x18b   :  { %v1275_v24 = vsel %vm1243_vm1, %v2226_v45, %v1259_v54 }
 0x18c   :  { %v1284_v26 = vpack.c.bf16 %v1276_v13, %v1275_v24  ;;  %1420 = vadd.xlane.f32.xlu0 %v1419_v23  ;;  %v1379_v15 = vadd.f32 %v1362_v20, %v1331_v22 }
 0x18e   :  { %1292 = vst [vmem:[#allocation2 + $0x38] sm:$0xff] %v1284_v26  ;;  %v1411_v29 = vsub.f32 %v1395_v28, %v1379_v15 }
 0x18f   :  { %1448 = dma.vmem_to_hbm [thread:$0]  %s1441_s1, 1024, %s1443_s0, [#allocation3], %s2256_s30, %s2256_s30, %s2257_s6  }
 0x190   :  { %v1427_v35 = vadd.f32 %v1426_v30, %v1411_v29 }
 0x192   :  { %v1428_v37 = vadd.f32 %v1427_v35, %v1412_v31 }
 0x194   :  { %1429 = vadd.xlane.f32.xlu0 %v1428_v37 }
 0x1ff   :  { %v1421_v49 = vpop.xlane.xlu0 %1420 }
 0x200   :  { %v1431_v38 = vsub.f32 0.0, %v1421_v49 }
 0x202   :  { %1434 = vst.msk [vmem:[%s3343_s7] sm:$0xff] %vm1433_vm2, %v1431_v38 }
 0x207   :  { %v1430_v2 = vpop.xlane.xlu0 %1429 }
 0x208   :  { %v1432_v40 = vsub.f32 0.0, %v1430_v2 }
 0x20a   :  { %1435 = vst.msk [vmem:[%s3343_s7 + $0x8] sm:$0xff] %vm1433_vm2, %v1432_v40 }
 0x20b   :  { %2253 = dma.done.wait [#allocation3], 1024  }
 0x20c   :  { %2254 = vsyncadd [#allocation3], 4294966272 }
 0x20d   :  { %1457 = vsyncpa [#allocation3], 1 }

</bundles_post_ra>
